<compile_context>
chip_gen: v7x
topology: tpu7x:2x2x1
jax: 0.10.0
libtpu: 0.0.40
codegen_flags: <defaults>
</compile_context>

<pallas_src>
import jax
import jax.numpy as jnp
from jax.experimental import pallas as pl
from jax.experimental.pallas import tpu as pltpu


def bilstm_kernel(x_ref,                            # (T*B, D) time-major rows
                  wih_f_ref, whh_f_ref, b_f_ref,    # (D,4H) (H,4H) (1,4H)
                  wih_r_ref, b_r_ref,               # (D,4H) (1,4H)
                  w1f_ref, w1r_ref, b1_ref,         # (H,H) (H,H) (1,H)
                  w2_ref, b2_ref,                   # (1,H) (1,1)
                  out_ref):                         # (B, 1)
    B = out_ref.shape[0]
    H = whh_f_ref.shape[0]
    T = x_ref.shape[0] // B

    # Hoisted input projection: one dense MXU matmul, bias folded.  Kept as a
    # traced value -- no VMEM scratch round trip on the recurrence path.
    gx = jnp.dot(x_ref[...], wih_f_ref[...],
                 preferred_element_type=jnp.float32) + b_f_ref[...]   # (T*B,4H) f32

    whh_f = whh_f_ref[...]

    # Gate columns arrive pre-permuted to [i, f, o, g].
    def lstm_step(gates, c):
        sfo = jax.nn.sigmoid(gates[:, 0:3 * H])     # one EUP pass for i, f, o
        i = sfo[:, 0:H]
        f = sfo[:, H:2 * H]
        o = sfo[:, 2 * H:3 * H]
        g = jnp.tanh(gates[:, 3 * H:4 * H])
        c_new = f * c + i * g
        return o * jnp.tanh(c_new), c_new

    h = jnp.zeros((B, H), jnp.float32)
    c = jnp.zeros((B, H), jnp.float32)
    # Statically unrolled forward recurrence: only h @ Whh_f + gate math on the
    # serial path; gx sliced with static offsets (no dynamic_slice / scratch).
    # Whh_f is loop-invariant, so the MXU RHS push can stay hoisted.
    for t in range(T):
        gates = gx[t * B:(t + 1) * B, :] + jnp.dot(
            h.astype(whh_f.dtype), whh_f, preferred_element_type=jnp.float32)
        h, c = lstm_step(gates, c)

    # Reverse direction at t = T-1 is exactly one step from the zero state:
    # h0 @ Whh_r == 0 and c_new = i * g (the f-gate is irrelevant).
    gates_r = jnp.dot(x_ref[(T - 1) * B:T * B, :], wih_r_ref[...],
                      preferred_element_type=jnp.float32) + b_r_ref[...]
    i_r = jax.nn.sigmoid(gates_r[:, 0:H])
    o_r = jax.nn.sigmoid(gates_r[:, 2 * H:3 * H])
    g_r = jnp.tanh(gates_r[:, 3 * H:4 * H])
    h_r = o_r * jnp.tanh(i_r * g_r)

    # Head at the final timestep only: relu -> fc1 (split halves, no lane
    # concat) -> relu -> fc2 (VPU multiply + lane reduction, no N=1 matmul).
    yf = jnp.maximum(h, 0.0)
    yr = jnp.maximum(h_r, 0.0)
    y = (jnp.dot(yf.astype(w1f_ref.dtype), w1f_ref[...],
                 preferred_element_type=jnp.float32)
         + jnp.dot(yr.astype(w1r_ref.dtype), w1r_ref[...],
                   preferred_element_type=jnp.float32)
         + b1_ref[...])
    y = jnp.maximum(y, 0.0)
    out_ref[...] = jnp.sum(y * w2_ref[...], axis=-1, keepdims=True) + b2_ref[...]


def _reorder_gate_cols(w, H):
    """PyTorch LSTM gate column order [i, f, g, o] -> kernel order [i, f, o, g]."""
    return jnp.concatenate(
        [w[..., 0:2 * H], w[..., 3 * H:4 * H], w[..., 2 * H:3 * H]], axis=-1)


def bilstm_forward(x, params, *, compute_dtype=jnp.bfloat16):
    """BiLSTM forward pass.

    compute_dtype controls only the MXU operands (x, Wih, Whh, fc1); biases,
    gate nonlinearities and all accumulation stay f32 (also the correct split
    for v5e, which has no bf16 VPU/EUP).  Pass jnp.float32 for exact parity
    with the f32 PyTorch reference.
    """
    B, C, F, T = x.shape
    D = C * F
    H = params["whh_f"].shape[0]

    # Single relayout: (B, C, F, T) -> time-major rows (T*B, C*F).
    x_seq = jnp.transpose(x, (3, 0, 1, 2)).reshape(T * B, D).astype(compute_dtype)

    cast = lambda w: w.astype(compute_dtype)
    wih_f = cast(_reorder_gate_cols(params["wih_f"], H))
    whh_f = cast(_reorder_gate_cols(params["whh_f"], H))
    b_f = _reorder_gate_cols(params["b_f"], H)
    wih_r = cast(_reorder_gate_cols(params["wih_r"], H))
    b_r = _reorder_gate_cols(params["b_r"], H)
    w1_f = cast(params["w1"][:H])        # forward half of the 2H concat
    w1_r = cast(params["w1"][H:])        # reverse half
    b1, w2, b2 = params["b1"], params["w2"], params["b2"]

    operands = (x_seq, wih_f, whh_f, b_f, wih_r, b_r, w1_f, w1_r, b1, w2, b2)

    # VMEM budget derived from the actual buffers (2x headroom for buffering
    # plus compute slack), instead of a hard-coded 32 MiB.
    operand_bytes = sum(int(a.size) * a.dtype.itemsize for a in operands)
    vmem_limit = int(min(100 * 1024 * 1024,
                         max(4 * 1024 * 1024, 2 * operand_bytes + (2 << 20))))

    vmem = pl.BlockSpec(memory_space=pltpu.MemorySpace.VMEM)
    return pl.pallas_call(
        bilstm_kernel,
        out_shape=jax.ShapeDtypeStruct((B, 1), jnp.float32),
        in_specs=[vmem] * len(operands),
        out_specs=vmem,
        compiler_params=pltpu.CompilerParams(vmem_limit_bytes=vmem_limit),
    )(*operands)


def init_params(key, input_dim, hidden_dim):
    """Deterministic init matching PyTorch parameter shapes (uniform +-1/sqrt(H)).

    Weights are stored transposed for x @ W with PyTorch gate order [i, f, g, o];
    the two LSTM biases are pre-summed.  whh_r exists for PyTorch parity but is
    mathematically unused (only the first reverse step, from the zero state, is
    ever needed)."""
    H, D = hidden_dim, input_dim
    k = 1.0 / jnp.sqrt(jnp.float32(H))
    keys = jax.random.split(key, 12)
    u = lambda kk, shape: jax.random.uniform(kk, shape, jnp.float32, -k, k)
    return {
        "wih_f": u(keys[0], (D, 4 * H)),
        "whh_f": u(keys[1], (H, 4 * H)),
        "b_f": (u(keys[2], (1, 4 * H)) + u(keys[3], (1, 4 * H))),
        "wih_r": u(keys[4], (D, 4 * H)),
        "whh_r": u(keys[5], (H, 4 * H)),
        "b_r": (u(keys[6], (1, 4 * H)) + u(keys[7], (1, 4 * H))),
        "w1": u(keys[8], (2 * H, H)),    # fc1: Linear(2H -> H), transposed
        "b1": u(keys[9], (1, H)),
        "w2": u(keys[10], (1, H)),       # fc2: Linear(H -> 1) as a row
        "b2": u(keys[11], (1, 1)),
    }


if __name__ == "__main__":
    # Small demo shapes: batch=2, channels=4, freq_bins=16, time_steps=8.
    # hidden_dim=128 is the smallest lane-aligned hidden size, so every gate
    # slice on the serial recurrence path is a full 128-lane vreg.
    B, C, F, T, H = 2, 4, 16, 8, 128
    key = jax.random.PRNGKey(0)
    kx, kp = jax.random.split(key)
    x = jax.random.normal(kx, (B, C, F, T), dtype=jnp.float32)
    params = init_params(kp, C * F, H)

    out = bilstm_forward(x, params)
    out = jax.block_until_ready(out)
    assert out.shape == (B, 1), out.shape
    print("KERNEL_OK")
</pallas_src>

<mosaic_0001>
module attributes {stable_mosaic.version = 11 : i64} {
  func.func @bilstm_kernel(%arg0: memref<16x64xbf16, #tpu.memory_space<vmem>>, %arg1: memref<64x512xbf16, #tpu.memory_space<vmem>>, %arg2: memref<128x512xbf16, #tpu.memory_space<vmem>>, %arg3: memref<1x512xf32, #tpu.memory_space<vmem>>, %arg4: memref<64x512xbf16, #tpu.memory_space<vmem>>, %arg5: memref<1x512xf32, #tpu.memory_space<vmem>>, %arg6: memref<128x128xbf16, #tpu.memory_space<vmem>>, %arg7: memref<128x128xbf16, #tpu.memory_space<vmem>>, %arg8: memref<1x128xf32, #tpu.memory_space<vmem>>, %arg9: memref<1x128xf32, #tpu.memory_space<vmem>>, %arg10: memref<1x1xf32, #tpu.memory_space<vmem>>, %arg11: memref<2x1xf32, #tpu.memory_space<vmem>>) attributes {dimension_semantics = [], scalar_prefetch = 0 : i64, scratch_operands = 0 : i64, tpu.core_type = #tpu.core_type<tc>} {
    %c0 = arith.constant 0 : index
    %c0_0 = arith.constant 0 : index
    %0 = vector.load %arg0[%c0, %c0_0] : memref<16x64xbf16, #tpu.memory_space<vmem>>, vector<16x64xbf16>
    %c0_1 = arith.constant 0 : index
    %c0_2 = arith.constant 0 : index
    %1 = vector.load %arg1[%c0_1, %c0_2] : memref<64x512xbf16, #tpu.memory_space<vmem>>, vector<64x512xbf16>
    %cst = arith.constant dense<0.000000e+00> : vector<16x512xf32>
    %2 = tpu.matmul %0, %1, %cst {dimension_numbers = #tpu.dot_dimension_numbers<[1], [0], [0], [1], [0, 0, 1, 1], [], []>} : vector<16x64xbf16>, vector<64x512xbf16>, vector<16x512xf32> -> vector<16x512xf32>
    %c0_3 = arith.constant 0 : index
    %c0_4 = arith.constant 0 : index
    %3 = vector.load %arg3[%c0_3, %c0_4] : memref<1x512xf32, #tpu.memory_space<vmem>>, vector<1x512xf32>
    %4 = vector.broadcast %3 : vector<1x512xf32> to vector<16x512xf32>
    %5 = arith.addf %2, %4 : vector<16x512xf32>
    %c0_5 = arith.constant 0 : index
    %c0_6 = arith.constant 0 : index
    %6 = vector.load %arg2[%c0_5, %c0_6] : memref<128x512xbf16, #tpu.memory_space<vmem>>, vector<128x512xbf16>
    %cst_7 = arith.constant 0.000000e+00 : f32
    %7 = vector.broadcast %cst_7 : f32 to vector<2x128xf32>
    %cst_8 = arith.constant 0.000000e+00 : f32
    %8 = vector.broadcast %cst_8 : f32 to vector<2x128xf32>
    %9 = vector.extract_strided_slice %5 {offsets = [0, 0], sizes = [2, 512], strides = [1, 1]} : vector<16x512xf32> to vector<2x512xf32>
    %10 = arith.truncf %7 : vector<2x128xf32> to vector<2x128xbf16>
    %cst_9 = arith.constant dense<0.000000e+00> : vector<2x512xf32>
    %11 = tpu.matmul %10, %6, %cst_9 {dimension_numbers = #tpu.dot_dimension_numbers<[1], [0], [0], [1], [0, 0, 1, 1], [], []>} : vector<2x128xbf16>, vector<128x512xbf16>, vector<2x512xf32> -> vector<2x512xf32>
    %12 = arith.addf %9, %11 : vector<2x512xf32>
    %13 = vector.extract_strided_slice %12 {offsets = [0, 0], sizes = [2, 384], strides = [1, 1]} : vector<2x512xf32> to vector<2x384xf32>
    %14 = arith.negf %13 : vector<2x384xf32>
    %15 = math.exp %14 : vector<2x384xf32>
    %cst_10 = arith.constant 1.000000e+00 : f32
    %16 = vector.broadcast %cst_10 : f32 to vector<2x384xf32>
    %17 = arith.addf %16, %15 : vector<2x384xf32>
    %18 = arith.divf %16, %17 : vector<2x384xf32>
    %19 = vector.extract_strided_slice %18 {offsets = [0, 0], sizes = [2, 128], strides = [1, 1]} : vector<2x384xf32> to vector<2x128xf32>
    %20 = vector.extract_strided_slice %18 {offsets = [0, 128], sizes = [2, 128], strides = [1, 1]} : vector<2x384xf32> to vector<2x128xf32>
    %21 = vector.extract_strided_slice %18 {offsets = [0, 256], sizes = [2, 128], strides = [1, 1]} : vector<2x384xf32> to vector<2x128xf32>
    %22 = vector.extract_strided_slice %12 {offsets = [0, 384], sizes = [2, 128], strides = [1, 1]} : vector<2x512xf32> to vector<2x128xf32>
    %23 = math.tanh %22 : vector<2x128xf32>
    %24 = arith.mulf %20, %8 : vector<2x128xf32>
    %25 = arith.mulf %19, %23 : vector<2x128xf32>
    %26 = arith.addf %24, %25 : vector<2x128xf32>
    %27 = math.tanh %26 : vector<2x128xf32>
    %28 = arith.mulf %21, %27 : vector<2x128xf32>
    %29 = vector.extract_strided_slice %5 {offsets = [2, 0], sizes = [2, 512], strides = [1, 1]} : vector<16x512xf32> to vector<2x512xf32>
    %30 = arith.truncf %28 : vector<2x128xf32> to vector<2x128xbf16>
    %cst_11 = arith.constant dense<0.000000e+00> : vector<2x512xf32>
    %31 = tpu.matmul %30, %6, %cst_11 {dimension_numbers = #tpu.dot_dimension_numbers<[1], [0], [0], [1], [0, 0, 1, 1], [], []>} : vector<2x128xbf16>, vector<128x512xbf16>, vector<2x512xf32> -> vector<2x512xf32>
    %32 = arith.addf %29, %31 : vector<2x512xf32>
    %33 = vector.extract_strided_slice %32 {offsets = [0, 0], sizes = [2, 384], strides = [1, 1]} : vector<2x512xf32> to vector<2x384xf32>
    %34 = arith.negf %33 : vector<2x384xf32>
    %35 = math.exp %34 : vector<2x384xf32>
    %cst_12 = arith.constant 1.000000e+00 : f32
    %36 = vector.broadcast %cst_12 : f32 to vector<2x384xf32>
    %37 = arith.addf %36, %35 : vector<2x384xf32>
    %38 = arith.divf %36, %37 : vector<2x384xf32>
    %39 = vector.extract_strided_slice %38 {offsets = [0, 0], sizes = [2, 128], strides = [1, 1]} : vector<2x384xf32> to vector<2x128xf32>
    %40 = vector.extract_strided_slice %38 {offsets = [0, 128], sizes = [2, 128], strides = [1, 1]} : vector<2x384xf32> to vector<2x128xf32>
    %41 = vector.extract_strided_slice %38 {offsets = [0, 256], sizes = [2, 128], strides = [1, 1]} : vector<2x384xf32> to vector<2x128xf32>
    %42 = vector.extract_strided_slice %32 {offsets = [0, 384], sizes = [2, 128], strides = [1, 1]} : vector<2x512xf32> to vector<2x128xf32>
    %43 = math.tanh %42 : vector<2x128xf32>
    %44 = arith.mulf %40, %26 : vector<2x128xf32>
    %45 = arith.mulf %39, %43 : vector<2x128xf32>
    %46 = arith.addf %44, %45 : vector<2x128xf32>
    %47 = math.tanh %46 : vector<2x128xf32>
    %48 = arith.mulf %41, %47 : vector<2x128xf32>
    %49 = vector.extract_strided_slice %5 {offsets = [4, 0], sizes = [2, 512], strides = [1, 1]} : vector<16x512xf32> to vector<2x512xf32>
    %50 = arith.truncf %48 : vector<2x128xf32> to vector<2x128xbf16>
    %cst_13 = arith.constant dense<0.000000e+00> : vector<2x512xf32>
    %51 = tpu.matmul %50, %6, %cst_13 {dimension_numbers = #tpu.dot_dimension_numbers<[1], [0], [0], [1], [0, 0, 1, 1], [], []>} : vector<2x128xbf16>, vector<128x512xbf16>, vector<2x512xf32> -> vector<2x512xf32>
    %52 = arith.addf %49, %51 : vector<2x512xf32>
    %53 = vector.extract_strided_slice %52 {offsets = [0, 0], sizes = [2, 384], strides = [1, 1]} : vector<2x512xf32> to vector<2x384xf32>
    %54 = arith.negf %53 : vector<2x384xf32>
    %55 = math.exp %54 : vector<2x384xf32>
    %cst_14 = arith.constant 1.000000e+00 : f32
    %56 = vector.broadcast %cst_14 : f32 to vector<2x384xf32>
    %57 = arith.addf %56, %55 : vector<2x384xf32>
    %58 = arith.divf %56, %57 : vector<2x384xf32>
    %59 = vector.extract_strided_slice %58 {offsets = [0, 0], sizes = [2, 128], strides = [1, 1]} : vector<2x384xf32> to vector<2x128xf32>
    %60 = vector.extract_strided_slice %58 {offsets = [0, 128], sizes = [2, 128], strides = [1, 1]} : vector<2x384xf32> to vector<2x128xf32>
    %61 = vector.extract_strided_slice %58 {offsets = [0, 256], sizes = [2, 128], strides = [1, 1]} : vector<2x384xf32> to vector<2x128xf32>
    %62 = vector.extract_strided_slice %52 {offsets = [0, 384], sizes = [2, 128], strides = [1, 1]} : vector<2x512xf32> to vector<2x128xf32>
    %63 = math.tanh %62 : vector<2x128xf32>
    %64 = arith.mulf %60, %46 : vector<2x128xf32>
    %65 = arith.mulf %59, %63 : vector<2x128xf32>
    %66 = arith.addf %64, %65 : vector<2x128xf32>
    %67 = math.tanh %66 : vector<2x128xf32>
    %68 = arith.mulf %61, %67 : vector<2x128xf32>
    %69 = vector.extract_strided_slice %5 {offsets = [6, 0], sizes = [2, 512], strides = [1, 1]} : vector<16x512xf32> to vector<2x512xf32>
    %70 = arith.truncf %68 : vector<2x128xf32> to vector<2x128xbf16>
    %cst_15 = arith.constant dense<0.000000e+00> : vector<2x512xf32>
    %71 = tpu.matmul %70, %6, %cst_15 {dimension_numbers = #tpu.dot_dimension_numbers<[1], [0], [0], [1], [0, 0, 1, 1], [], []>} : vector<2x128xbf16>, vector<128x512xbf16>, vector<2x512xf32> -> vector<2x512xf32>
    %72 = arith.addf %69, %71 : vector<2x512xf32>
    %73 = vector.extract_strided_slice %72 {offsets = [0, 0], sizes = [2, 384], strides = [1, 1]} : vector<2x512xf32> to vector<2x384xf32>
    %74 = arith.negf %73 : vector<2x384xf32>
    %75 = math.exp %74 : vector<2x384xf32>
    %cst_16 = arith.constant 1.000000e+00 : f32
    %76 = vector.broadcast %cst_16 : f32 to vector<2x384xf32>
    %77 = arith.addf %76, %75 : vector<2x384xf32>
    %78 = arith.divf %76, %77 : vector<2x384xf32>
    %79 = vector.extract_strided_slice %78 {offsets = [0, 0], sizes = [2, 128], strides = [1, 1]} : vector<2x384xf32> to vector<2x128xf32>
    %80 = vector.extract_strided_slice %78 {offsets = [0, 128], sizes = [2, 128], strides = [1, 1]} : vector<2x384xf32> to vector<2x128xf32>
    %81 = vector.extract_strided_slice %78 {offsets = [0, 256], sizes = [2, 128], strides = [1, 1]} : vector<2x384xf32> to vector<2x128xf32>
    %82 = vector.extract_strided_slice %72 {offsets = [0, 384], sizes = [2, 128], strides = [1, 1]} : vector<2x512xf32> to vector<2x128xf32>
    %83 = math.tanh %82 : vector<2x128xf32>
    %84 = arith.mulf %80, %66 : vector<2x128xf32>
    %85 = arith.mulf %79, %83 : vector<2x128xf32>
    %86 = arith.addf %84, %85 : vector<2x128xf32>
    %87 = math.tanh %86 : vector<2x128xf32>
    %88 = arith.mulf %81, %87 : vector<2x128xf32>
    %89 = vector.extract_strided_slice %5 {offsets = [8, 0], sizes = [2, 512], strides = [1, 1]} : vector<16x512xf32> to vector<2x512xf32>
    %90 = arith.truncf %88 : vector<2x128xf32> to vector<2x128xbf16>
    %cst_17 = arith.constant dense<0.000000e+00> : vector<2x512xf32>
    %91 = tpu.matmul %90, %6, %cst_17 {dimension_numbers = #tpu.dot_dimension_numbers<[1], [0], [0], [1], [0, 0, 1, 1], [], []>} : vector<2x128xbf16>, vector<128x512xbf16>, vector<2x512xf32> -> vector<2x512xf32>
    %92 = arith.addf %89, %91 : vector<2x512xf32>
    %93 = vector.extract_strided_slice %92 {offsets = [0, 0], sizes = [2, 384], strides = [1, 1]} : vector<2x512xf32> to vector<2x384xf32>
    %94 = arith.negf %93 : vector<2x384xf32>
    %95 = math.exp %94 : vector<2x384xf32>
    %cst_18 = arith.constant 1.000000e+00 : f32
    %96 = vector.broadcast %cst_18 : f32 to vector<2x384xf32>
    %97 = arith.addf %96, %95 : vector<2x384xf32>
    %98 = arith.divf %96, %97 : vector<2x384xf32>
    %99 = vector.extract_strided_slice %98 {offsets = [0, 0], sizes = [2, 128], strides = [1, 1]} : vector<2x384xf32> to vector<2x128xf32>
    %100 = vector.extract_strided_slice %98 {offsets = [0, 128], sizes = [2, 128], strides = [1, 1]} : vector<2x384xf32> to vector<2x128xf32>
    %101 = vector.extract_strided_slice %98 {offsets = [0, 256], sizes = [2, 128], strides = [1, 1]} : vector<2x384xf32> to vector<2x128xf32>
    %102 = vector.extract_strided_slice %92 {offsets = [0, 384], sizes = [2, 128], strides = [1, 1]} : vector<2x512xf32> to vector<2x128xf32>
    %103 = math.tanh %102 : vector<2x128xf32>
    %104 = arith.mulf %100, %86 : vector<2x128xf32>
    %105 = arith.mulf %99, %103 : vector<2x128xf32>
    %106 = arith.addf %104, %105 : vector<2x128xf32>
    %107 = math.tanh %106 : vector<2x128xf32>
    %108 = arith.mulf %101, %107 : vector<2x128xf32>
    %109 = vector.extract_strided_slice %5 {offsets = [10, 0], sizes = [2, 512], strides = [1, 1]} : vector<16x512xf32> to vector<2x512xf32>
    %110 = arith.truncf %108 : vector<2x128xf32> to vector<2x128xbf16>
    %cst_19 = arith.constant dense<0.000000e+00> : vector<2x512xf32>
    %111 = tpu.matmul %110, %6, %cst_19 {dimension_numbers = #tpu.dot_dimension_numbers<[1], [0], [0], [1], [0, 0, 1, 1], [], []>} : vector<2x128xbf16>, vector<128x512xbf16>, vector<2x512xf32> -> vector<2x512xf32>
    %112 = arith.addf %109, %111 : vector<2x512xf32>
    %113 = vector.extract_strided_slice %112 {offsets = [0, 0], sizes = [2, 384], strides = [1, 1]} : vector<2x512xf32> to vector<2x384xf32>
    %114 = arith.negf %113 : vector<2x384xf32>
    %115 = math.exp %114 : vector<2x384xf32>
    %cst_20 = arith.constant 1.000000e+00 : f32
    %116 = vector.broadcast %cst_20 : f32 to vector<2x384xf32>
    %117 = arith.addf %116, %115 : vector<2x384xf32>
    %118 = arith.divf %116, %117 : vector<2x384xf32>
    %119 = vector.extract_strided_slice %118 {offsets = [0, 0], sizes = [2, 128], strides = [1, 1]} : vector<2x384xf32> to vector<2x128xf32>
    %120 = vector.extract_strided_slice %118 {offsets = [0, 128], sizes = [2, 128], strides = [1, 1]} : vector<2x384xf32> to vector<2x128xf32>
    %121 = vector.extract_strided_slice %118 {offsets = [0, 256], sizes = [2, 128], strides = [1, 1]} : vector<2x384xf32> to vector<2x128xf32>
    %122 = vector.extract_strided_slice %112 {offsets = [0, 384], sizes = [2, 128], strides = [1, 1]} : vector<2x512xf32> to vector<2x128xf32>
    %123 = math.tanh %122 : vector<2x128xf32>
    %124 = arith.mulf %120, %106 : vector<2x128xf32>
    %125 = arith.mulf %119, %123 : vector<2x128xf32>
    %126 = arith.addf %124, %125 : vector<2x128xf32>
    %127 = math.tanh %126 : vector<2x128xf32>
    %128 = arith.mulf %121, %127 : vector<2x128xf32>
    %129 = vector.extract_strided_slice %5 {offsets = [12, 0], sizes = [2, 512], strides = [1, 1]} : vector<16x512xf32> to vector<2x512xf32>
    %130 = arith.truncf %128 : vector<2x128xf32> to vector<2x128xbf16>
    %cst_21 = arith.constant dense<0.000000e+00> : vector<2x512xf32>
    %131 = tpu.matmul %130, %6, %cst_21 {dimension_numbers = #tpu.dot_dimension_numbers<[1], [0], [0], [1], [0, 0, 1, 1], [], []>} : vector<2x128xbf16>, vector<128x512xbf16>, vector<2x512xf32> -> vector<2x512xf32>
    %132 = arith.addf %129, %131 : vector<2x512xf32>
    %133 = vector.extract_strided_slice %132 {offsets = [0, 0], sizes = [2, 384], strides = [1, 1]} : vector<2x512xf32> to vector<2x384xf32>
    %134 = arith.negf %133 : vector<2x384xf32>
    %135 = math.exp %134 : vector<2x384xf32>
    %cst_22 = arith.constant 1.000000e+00 : f32
    %136 = vector.broadcast %cst_22 : f32 to vector<2x384xf32>
    %137 = arith.addf %136, %135 : vector<2x384xf32>
    %138 = arith.divf %136, %137 : vector<2x384xf32>
    %139 = vector.extract_strided_slice %138 {offsets = [0, 0], sizes = [2, 128], strides = [1, 1]} : vector<2x384xf32> to vector<2x128xf32>
    %140 = vector.extract_strided_slice %138 {offsets = [0, 128], sizes = [2, 128], strides = [1, 1]} : vector<2x384xf32> to vector<2x128xf32>
    %141 = vector.extract_strided_slice %138 {offsets = [0, 256], sizes = [2, 128], strides = [1, 1]} : vector<2x384xf32> to vector<2x128xf32>
    %142 = vector.extract_strided_slice %132 {offsets = [0, 384], sizes = [2, 128], strides = [1, 1]} : vector<2x512xf32> to vector<2x128xf32>
    %143 = math.tanh %142 : vector<2x128xf32>
    %144 = arith.mulf %140, %126 : vector<2x128xf32>
    %145 = arith.mulf %139, %143 : vector<2x128xf32>
    %146 = arith.addf %144, %145 : vector<2x128xf32>
    %147 = math.tanh %146 : vector<2x128xf32>
    %148 = arith.mulf %141, %147 : vector<2x128xf32>
    %149 = vector.extract_strided_slice %5 {offsets = [14, 0], sizes = [2, 512], strides = [1, 1]} : vector<16x512xf32> to vector<2x512xf32>
    %150 = arith.truncf %148 : vector<2x128xf32> to vector<2x128xbf16>
    %cst_23 = arith.constant dense<0.000000e+00> : vector<2x512xf32>
    %151 = tpu.matmul %150, %6, %cst_23 {dimension_numbers = #tpu.dot_dimension_numbers<[1], [0], [0], [1], [0, 0, 1, 1], [], []>} : vector<2x128xbf16>, vector<128x512xbf16>, vector<2x512xf32> -> vector<2x512xf32>
    %152 = arith.addf %149, %151 : vector<2x512xf32>
    %153 = vector.extract_strided_slice %152 {offsets = [0, 0], sizes = [2, 384], strides = [1, 1]} : vector<2x512xf32> to vector<2x384xf32>
    %154 = arith.negf %153 : vector<2x384xf32>
    %155 = math.exp %154 : vector<2x384xf32>
    %cst_24 = arith.constant 1.000000e+00 : f32
    %156 = vector.broadcast %cst_24 : f32 to vector<2x384xf32>
    %157 = arith.addf %156, %155 : vector<2x384xf32>
    %158 = arith.divf %156, %157 : vector<2x384xf32>
    %159 = vector.extract_strided_slice %158 {offsets = [0, 0], sizes = [2, 128], strides = [1, 1]} : vector<2x384xf32> to vector<2x128xf32>
    %160 = vector.extract_strided_slice %158 {offsets = [0, 128], sizes = [2, 128], strides = [1, 1]} : vector<2x384xf32> to vector<2x128xf32>
    %161 = vector.extract_strided_slice %158 {offsets = [0, 256], sizes = [2, 128], strides = [1, 1]} : vector<2x384xf32> to vector<2x128xf32>
    %162 = vector.extract_strided_slice %152 {offsets = [0, 384], sizes = [2, 128], strides = [1, 1]} : vector<2x512xf32> to vector<2x128xf32>
    %163 = math.tanh %162 : vector<2x128xf32>
    %164 = arith.mulf %160, %146 : vector<2x128xf32>
    %165 = arith.mulf %159, %163 : vector<2x128xf32>
    %166 = arith.addf %164, %165 : vector<2x128xf32>
    %167 = math.tanh %166 : vector<2x128xf32>
    %168 = arith.mulf %161, %167 : vector<2x128xf32>
    %c14 = arith.constant 14 : index
    %c0_25 = arith.constant 0 : index
    %169 = vector.load %arg0[%c14, %c0_25] : memref<16x64xbf16, #tpu.memory_space<vmem>>, vector<2x64xbf16>
    %c0_26 = arith.constant 0 : index
    %c0_27 = arith.constant 0 : index
    %170 = vector.load %arg4[%c0_26, %c0_27] : memref<64x512xbf16, #tpu.memory_space<vmem>>, vector<64x512xbf16>
    %cst_28 = arith.constant dense<0.000000e+00> : vector<2x512xf32>
    %171 = tpu.matmul %169, %170, %cst_28 {dimension_numbers = #tpu.dot_dimension_numbers<[1], [0], [0], [1], [0, 0, 1, 1], [], []>} : vector<2x64xbf16>, vector<64x512xbf16>, vector<2x512xf32> -> vector<2x512xf32>
    %c0_29 = arith.constant 0 : index
    %c0_30 = arith.constant 0 : index
    %172 = vector.load %arg5[%c0_29, %c0_30] : memref<1x512xf32, #tpu.memory_space<vmem>>, vector<1x512xf32>
    %173 = vector.broadcast %172 : vector<1x512xf32> to vector<2x512xf32>
    %174 = arith.addf %171, %173 : vector<2x512xf32>
    %175 = vector.extract_strided_slice %174 {offsets = [0, 0], sizes = [2, 128], strides = [1, 1]} : vector<2x512xf32> to vector<2x128xf32>
    %176 = arith.negf %175 : vector<2x128xf32>
    %177 = math.exp %176 : vector<2x128xf32>
    %cst_31 = arith.constant 1.000000e+00 : f32
    %178 = vector.broadcast %cst_31 : f32 to vector<2x128xf32>
    %179 = arith.addf %178, %177 : vector<2x128xf32>
    %180 = arith.divf %178, %179 : vector<2x128xf32>
    %181 = vector.extract_strided_slice %174 {offsets = [0, 256], sizes = [2, 128], strides = [1, 1]} : vector<2x512xf32> to vector<2x128xf32>
    %182 = arith.negf %181 : vector<2x128xf32>
    %183 = math.exp %182 : vector<2x128xf32>
    %cst_32 = arith.constant 1.000000e+00 : f32
    %184 = vector.broadcast %cst_32 : f32 to vector<2x128xf32>
    %185 = arith.addf %184, %183 : vector<2x128xf32>
    %186 = arith.divf %184, %185 : vector<2x128xf32>
    %187 = vector.extract_strided_slice %174 {offsets = [0, 384], sizes = [2, 128], strides = [1, 1]} : vector<2x512xf32> to vector<2x128xf32>
    %188 = math.tanh %187 : vector<2x128xf32>
    %189 = arith.mulf %180, %188 : vector<2x128xf32>
    %190 = math.tanh %189 : vector<2x128xf32>
    %191 = arith.mulf %186, %190 : vector<2x128xf32>
    %cst_33 = arith.constant 0.000000e+00 : f32
    %192 = vector.broadcast %cst_33 : f32 to vector<2x128xf32>
    %193 = arith.maximumf %168, %192 : vector<2x128xf32>
    %cst_34 = arith.constant 0.000000e+00 : f32
    %194 = vector.broadcast %cst_34 : f32 to vector<2x128xf32>
    %195 = arith.maximumf %191, %194 : vector<2x128xf32>
    %196 = arith.truncf %193 : vector<2x128xf32> to vector<2x128xbf16>
    %c0_35 = arith.constant 0 : index
    %c0_36 = arith.constant 0 : index
    %197 = vector.load %arg6[%c0_35, %c0_36] : memref<128x128xbf16, #tpu.memory_space<vmem>>, vector<128x128xbf16>
    %cst_37 = arith.constant dense<0.000000e+00> : vector<2x128xf32>
    %198 = tpu.matmul %196, %197, %cst_37 {dimension_numbers = #tpu.dot_dimension_numbers<[1], [0], [0], [1], [0, 0, 1, 1], [], []>} : vector<2x128xbf16>, vector<128x128xbf16>, vector<2x128xf32> -> vector<2x128xf32>
    %199 = arith.truncf %195 : vector<2x128xf32> to vector<2x128xbf16>
    %c0_38 = arith.constant 0 : index
    %c0_39 = arith.constant 0 : index
    %200 = vector.load %arg7[%c0_38, %c0_39] : memref<128x128xbf16, #tpu.memory_space<vmem>>, vector<128x128xbf16>
    %cst_40 = arith.constant dense<0.000000e+00> : vector<2x128xf32>
    %201 = tpu.matmul %199, %200, %cst_40 {dimension_numbers = #tpu.dot_dimension_numbers<[1], [0], [0], [1], [0, 0, 1, 1], [], []>} : vector<2x128xbf16>, vector<128x128xbf16>, vector<2x128xf32> -> vector<2x128xf32>
    %202 = arith.addf %198, %201 : vector<2x128xf32>
    %c0_41 = arith.constant 0 : index
    %c0_42 = arith.constant 0 : index
    %203 = vector.load %arg8[%c0_41, %c0_42] : memref<1x128xf32, #tpu.memory_space<vmem>>, vector<1x128xf32>
    %204 = vector.broadcast %203 : vector<1x128xf32> to vector<2x128xf32>
    %205 = arith.addf %202, %204 : vector<2x128xf32>
    %cst_43 = arith.constant 0.000000e+00 : f32
    %206 = vector.broadcast %cst_43 : f32 to vector<2x128xf32>
    %207 = arith.maximumf %205, %206 : vector<2x128xf32>
    %c0_44 = arith.constant 0 : index
    %c0_45 = arith.constant 0 : index
    %208 = vector.load %arg9[%c0_44, %c0_45] : memref<1x128xf32, #tpu.memory_space<vmem>>, vector<1x128xf32>
    %209 = vector.broadcast %208 : vector<1x128xf32> to vector<2x128xf32>
    %210 = arith.mulf %207, %209 : vector<2x128xf32>
    %cst_46 = arith.constant dense<0.000000e+00> : vector<2xf32>
    %211 = vector.multi_reduction <add>, %210, %cst_46 [1] : vector<2x128xf32> to vector<2xf32>
    %212 = vector.shape_cast %211 : vector<2xf32> to vector<2x1xf32>
    %c0_47 = arith.constant 0 : index
    %c0_48 = arith.constant 0 : index
    %213 = vector.load %arg10[%c0_47, %c0_48] : memref<1x1xf32, #tpu.memory_space<vmem>>, vector<1x1xf32>
    %214 = vector.broadcast %213 : vector<1x1xf32> to vector<2x1xf32>
    %215 = arith.addf %212, %214 : vector<2x1xf32>
    %c0_49 = arith.constant 0 : index
    %c0_50 = arith.constant 0 : index
    %216 = vector.load %arg11[%c0_49, %c0_50] : memref<2x1xf32, #tpu.memory_space<vmem>>, vector<2x1xf32>
    tpu.vector_store %arg11[%c0_49, %c0_50], %215 {strides = array<i32>} : memref<2x1xf32, #tpu.memory_space<vmem>>, vector<2x1xf32>,
    return
  }
}

</mosaic_0001>

<bundles_post_ra>
// kernel: tpu_custom_call.1
= control target key start
LH: loop header
LB: loop body
LE: loop exit
PB: predicated region body
PF: predicated region fallthrough
CT: control target
= control target key end

     0   :  { %s3276_s0 = inlined_call_operand.hbm [shape: bf16[16,64], index: 0, kind: input, shape index: {}]   ;;  %s3277_s1 = inlined_call_operand.hbm [shape: bf16[64,512], index: 1, kind: input, shape index: {}]   ;;  %s3278_s2 = inlined_call_operand.hbm [shape: bf16[128,512], index: 2, kind: input, shape index: {}]   ;;  %s3279_s3 = inlined_call_operand.vmem [shape: f32[1,512], index: 3, kind: input, shape index: {}]   ;;  %s3280_s4 = inlined_call_operand.hbm [shape: bf16[64,512], index: 4, kind: input, shape index: {}]   ;;  %s3281_s5 = inlined_call_operand.vmem [shape: f32[1,512], index: 5, kind: input, shape index: {}]   ;;  %s3282_s6 = inlined_call_operand.hbm [shape: bf16[128,128], index: 6, kind: input, shape index: {}]   ;;  %s3283_s7 = inlined_call_operand.hbm [shape: bf16[128,128], index: 7, kind: input, shape index: {}]   ;;  %s3284_s8 = inlined_call_operand.vmem [shape: f32[1,128], index: 8, kind: input, shape index: {}]   ;;  %s3285_s9 = inlined_call_operand.vmem [shape: f32[1,128], index: 9, kind: input, shape index: {}]   ;;  %s3286_s10 = inlined_call_operand.<no memory space> [shape: f32[1,1], index: 10, kind: input, shape index: {}]   ;;  %s3287_s11 = inlined_call_operand.vmem [shape: f32[2,1], index: 11, kind: output, shape index: {}]  }
   0x1   :  { %v16_v0 = vstv %s3286_s10 }
   0x2   :  { %17 = vst [vmem:[#allocation2] sm:$0x1] %v16_v0 }
   0x3   :  { %18 = vsyncpa [#allocation4], 0 }
   0x4   :  { %19 = vsyncpa [#allocation6], 0 }
   0x5   :  { %20 = vsyncpa [#allocation9], 0 }
   0x6   :  { %21 = vsyncpa [#allocation12], 0  ;;  %s2609_s19 = smov [#allocation5]   ;;  %s2469_s23 = scalar_lea.hbm %s3277_s1, 2048 }
   0x7   :  { %s39_s20 = sshll.u32 %s2609_s19, 4  ;;  %p2470_p0 = scmp.ne.s32.totalorder %s3277_s1, %s2469_s23  ;;  %s40_s20 = int_to_ptr.vmem [resolvable:$true] %s39_s20 }
   0x8   :  { %p2473_p1 = scmp.lt.u32.totalorder %s2469_s23, %s3277_s1 }
   0xa   :  { %p2475_p2 = pnand %p2473_p1, %p2470_p0 }
   0xc   :  { %2478 = shalt.err (!%p2475_p2)
}
   0xd   :  { %s2479_s10 = scalar_lea.vmem %s40_s20, 2048  ;;  %p2484_p4 = scmp.lt.s32.totalorder %s40_s20, %s40_s20 }
   0xe   :  { %p2480_p3 = scmp.ne.s32.totalorder %s40_s20, %s2479_s10  ;;  %p2485_p5 = scmp.lt.s32.totalorder %s2479_s10, %s2479_s10 }
  0x10   :  { %p2486_p6 = por %p2485_p5, %p2484_p4 }
  0x12   :  { %p2487_p7 = pnand %p2486_p6, %p2480_p3 }
  0x14   :  { %2490 = shalt.err (!%p2487_p7)
}
  0x15   :  { %s2610_s28 = smov 256   ;;  %s2611_s29 = smov 16  }
  0x16   :  { %45 = dma.hbm_to_vmem [thread:$0]  %s3277_s1, 2048, %s40_s20, [#allocation6], %s2610_s28, %s2610_s28, %s2611_s29  }
  0x17   :  { %s2612_s13 = smov [#allocation8]   ;;  %s2613_s15 = smov [#allocation3]  }
  0x18   :  { %s65_s14 = sshll.u32 %s2612_s13, 4  ;;  %s27_s16 = sshll.u32 %s2613_s15, 4  ;;  %s66_s14 = int_to_ptr.vmem [resolvable:$true] %s65_s14  ;;  %s28_s16 = int_to_ptr.vmem [resolvable:$true] %s27_s16 }
  0x19   :  { %s2491_s19 = scalar_lea.hbm %s3280_s4, 2048 }
  0x1a   :  { %p2492_p8 = scmp.ne.s32.totalorder %s3280_s4, %s2491_s19  ;;  %p2495_p9 = scmp.lt.u32.totalorder %s2491_s19, %s3280_s4 }
  0x1c   :  { %p2497_p10 = pnand %p2495_p9, %p2492_p8 }
  0x1e   :  { %2500 = shalt.err (!%p2497_p10)
}
  0x1f   :  { %s2501_s1 = scalar_lea.vmem %s66_s14, 2048  ;;  %p2506_p12 = scmp.lt.s32.totalorder %s66_s14, %s66_s14 }
  0x20   :  { %p2502_p11 = scmp.ne.s32.totalorder %s66_s14, %s2501_s1  ;;  %p2507_p13 = scmp.lt.s32.totalorder %s2501_s1, %s2501_s1 }
  0x22   :  { %p2508_p0 = por %p2507_p13, %p2506_p12 }
  0x24   :  { %p2509_p1 = pnand %p2508_p0, %p2502_p11 }
  0x26   :  { %2512 = shalt.err (!%p2509_p1)
}
  0x27   :  { %71 = dma.hbm_to_vmem [thread:$0]  %s3280_s4, 2048, %s66_s14, [#allocation9], %s2610_s28, %s2610_s28, %s2611_s29  }
  0x28   :  { %s2513_s10 = scalar_lea.hbm %s3276_s0, 128 }
  0x29   :  { %p2514_p2 = scmp.ne.s32.totalorder %s3276_s0, %s2513_s10  ;;  %p2517_p3 = scmp.lt.u32.totalorder %s2513_s10, %s3276_s0 }
  0x2b   :  { %p2519_p4 = pnand %p2517_p3, %p2514_p2 }
  0x2d   :  { %2522 = shalt.err (!%p2519_p4)
}
  0x2e   :  { %s2523_s17 = scalar_lea.vmem %s28_s16, 128  ;;  %p2528_p6 = scmp.lt.s32.totalorder %s28_s16, %s28_s16 }
  0x2f   :  { %p2524_p5 = scmp.ne.s32.totalorder %s28_s16, %s2523_s17  ;;  %p2529_p7 = scmp.lt.s32.totalorder %s2523_s17, %s2523_s17 }
  0x31   :  { %p2530_p8 = por %p2529_p7, %p2528_p6 }
  0x33   :  { %p2531_p9 = pnand %p2530_p8, %p2524_p5 }
  0x35   :  { %2534 = shalt.err (!%p2531_p9)
}
  0x36   :  { %s2614_s4 = smov 64   ;;  %s2615_s14 = smov 4  }
  0x37   :  { %33 = dma.hbm_to_vmem [thread:$0]  %s3276_s0, 128, %s28_s16, [#allocation4], %s2614_s4, %s2614_s4, %s2615_s14  }
  0x38   :  { %s2616_s21 = smov [#allocation7]   ;;  %s2617_s23 = smov [#allocation10]  }
  0x39   :  { %s51_s22 = sshll.u32 %s2616_s21, 4  ;;  %s79_s24 = sshll.u32 %s2617_s23, 4  ;;  %s52_s22 = int_to_ptr.vmem [resolvable:$true] %s51_s22  ;;  %s80_s24 = int_to_ptr.vmem [resolvable:$true] %s79_s24 }
  0x3a   :  { %s2535_s25 = scalar_lea.hbm %s3278_s2, 4096 }
  0x3b   :  { %p2536_p10 = scmp.ne.s32.totalorder %s3278_s2, %s2535_s25  ;;  %p2539_p11 = scmp.lt.u32.totalorder %s2535_s25, %s3278_s2 }
  0x3d   :  { %p2541_p12 = pnand %p2539_p11, %p2536_p10 }
  0x3f   :  { %2544 = shalt.err (!%p2541_p12)
}
  0x40   :  { %s2545_s0 = scalar_lea.vmem %s52_s22, 4096  ;;  %p2550_p0 = scmp.lt.s32.totalorder %s52_s22, %s52_s22 }
  0x41   :  { %p2546_p13 = scmp.ne.s32.totalorder %s52_s22, %s2545_s0  ;;  %p2551_p1 = scmp.lt.s32.totalorder %s2545_s0, %s2545_s0 }
  0x43   :  { %p2552_p2 = por %p2551_p1, %p2550_p0 }
  0x45   :  { %p2553_p3 = pnand %p2552_p2, %p2546_p13 }
  0x47   :  { %2556 = shalt.err (!%p2553_p3)
}
  0x48   :  { %57 = dma.hbm_to_vmem [thread:$0]  %s3278_s2, 4096, %s52_s22, [#allocation6], %s2610_s28, %s2610_s28, %s2611_s29  }
  0x49   :  { %s2557_s17 = scalar_lea.hbm %s3282_s6, 1024 }
  0x4a   :  { %p2558_p4 = scmp.ne.s32.totalorder %s3282_s6, %s2557_s17  ;;  %p2561_p5 = scmp.lt.u32.totalorder %s2557_s17, %s3282_s6 }
  0x4c   :  { %p2563_p6 = pnand %p2561_p5, %p2558_p4 }
  0x4e   :  { %2566 = shalt.err (!%p2563_p6)
}
  0x4f   :  { %s2567_s1 = scalar_lea.vmem %s80_s24, 1024  ;;  %p2572_p8 = scmp.lt.s32.totalorder %s80_s24, %s80_s24 }
  0x50   :  { %p2568_p7 = scmp.ne.s32.totalorder %s80_s24, %s2567_s1  ;;  %p2573_p9 = scmp.lt.s32.totalorder %s2567_s1, %s2567_s1 }
  0x52   :  { %p2574_p10 = por %p2573_p9, %p2572_p8 }
  0x54   :  { %p2575_p11 = pnand %p2574_p10, %p2568_p7 }
  0x56   :  { %2578 = shalt.err (!%p2575_p11)
}
  0x57   :  { %85 = dma.hbm_to_vmem [thread:$0]  %s3282_s6, 1024, %s80_s24, [#allocation9], %s2614_s4, %s2614_s4, %s2615_s14  }
  0x58   :  { %s2618_s29 = smov [#allocation11]   ;;  %s2579_s26 = scalar_lea.hbm %s3283_s7, 1024 }
  0x59   :  { %s91_s22 = sshll.u32 %s2618_s29, 4  ;;  %p2580_p12 = scmp.ne.s32.totalorder %s3283_s7, %s2579_s26  ;;  %s92_s22 = int_to_ptr.vmem [resolvable:$true] %s91_s22 }
  0x5a   :  { %p2583_p13 = scmp.lt.u32.totalorder %s2579_s26, %s3283_s7 }
  0x5c   :  { %p2585_p0 = pnand %p2583_p13, %p2580_p12 }
  0x5e   :  { %2588 = shalt.err (!%p2585_p0)
}
  0x5f   :  { %s2589_s16 = scalar_lea.vmem %s92_s22, 1024  ;;  %p2594_p2 = scmp.lt.s32.totalorder %s92_s22, %s92_s22 }
  0x60   :  { %p2590_p1 = scmp.ne.s32.totalorder %s92_s22, %s2589_s16  ;;  %p2595_p3 = scmp.lt.s32.totalorder %s2589_s16, %s2589_s16 }
  0x62   :  { %p2596_p4 = por %p2595_p3, %p2594_p2 }
  0x64   :  { %p2597_p5 = pnand %p2596_p4, %p2590_p1 }
  0x66   :  { %2600 = shalt.err (!%p2597_p5)
}
  0x67   :  { %97 = dma.hbm_to_vmem [thread:$0]  %s3283_s7, 1024, %s92_s22, [#allocation12], %s2614_s4, %s2614_s4, %s2615_s14  }
  0x68   :  { %2601 = dma.done.wait [#allocation4], 128  }
  0x69   :  { %2602 = vsyncadd [#allocation4], 4294967168 }
  0x6a   :  { %2603 = dma.done.wait [#allocation6], 6144  }
  0x6b   :  { %2604 = vsyncadd [#allocation6], 4294961152 }
  0x6c   :  { %2605 = dma.done.wait [#allocation9], 3072  }
  0x6d   :  { %2606 = vsyncadd [#allocation9], 4294964224 }
  0x6e   :  { %2607 = dma.done.wait [#allocation12], 1024  }
  0x6f   :  { %2608 = vsyncadd [#allocation12], 4294966272  ;;  %v2619_v1 = vmov 0   ;;  %v2183_v2 = vld [vmem:[#allocation5 + $0x4] ss:$16 sps:$4 sm:$0xff]   ;;  %v2207_v20 = vld [vmem:[#allocation3] sm:$0xff]   ;;  %v143_v51 = vlaneseq }
  0x70   :  { %284 = vmatprep.mubr.bf16.mxu0 %v2619_v1  ;;  %327 = vmatprep.mubr.bf16.mxu1 %v2619_v1  ;;  %v2185_v3 = vld [vmem:[#allocation5 + $0xc] ss:$16 sps:$4 sm:$0xff]   ;;  %v2187_v4 = vld [vmem:[#allocation5] ss:$16 sps:$4 sm:$0xff]   ;;  %v2188_v5 = vld [vmem:[#allocation5 + $0x8] ss:$16 sps:$4 sm:$0xff]  }
  0x71   :  { %252 = vmatprep.subr.bf16.mxu0 %v2183_v2  ;;  %295 = vmatprep.subr.bf16.mxu1 %v2185_v3  ;;  %v2189_v6 = vld [vmem:[#allocation5 + $0x24] ss:$16 sps:$4 sm:$0xff]   ;;  %v2191_v7 = vld [vmem:[#allocation5 + $0x2c] ss:$16 sps:$4 sm:$0xff]   ;;  %v2193_v8 = vld [vmem:[#allocation5 + $0x20] ss:$16 sps:$4 sm:$0xff]  }
  0x72   :  { %253 = vmatpush1.bf16.msra.mxu0 %v2187_v4  ;;  %296 = vmatpush1.bf16.msra.mxu1 %v2188_v5  ;;  %v2194_v9 = vld [vmem:[#allocation5 + $0x28] ss:$16 sps:$4 sm:$0xff]   ;;  %v2195_v10 = vld [vmem:[#allocation5 + $0x44] ss:$16 sps:$4 sm:$0xff]   ;;  %v2197_v11 = vld [vmem:[#allocation5 + $0x4c] ss:$16 sps:$4 sm:$0xff]  }
  0x73   :  { %254 = vmatprep.subr.bf16.mxu0 %v2189_v6  ;;  %297 = vmatprep.subr.bf16.mxu1 %v2191_v7  ;;  %v2199_v12 = vld [vmem:[#allocation5 + $0x40] ss:$16 sps:$4 sm:$0xff]   ;;  %v2200_v13 = vld [vmem:[#allocation5 + $0x48] ss:$16 sps:$4 sm:$0xff]   ;;  %v2201_v14 = vld [vmem:[#allocation5 + $0x64] ss:$16 sps:$4 sm:$0xff]  }
  0x74   :  { %v2203_v15 = vld [vmem:[#allocation5 + $0x6c] ss:$16 sps:$4 sm:$0xff]   ;;  %v2205_v16 = vld [vmem:[#allocation5 + $0x60] ss:$16 sps:$4 sm:$0xff]   ;;  %v2206_v17 = vld [vmem:[#allocation5 + $0x68] ss:$16 sps:$4 sm:$0xff]  }
  0x75   :  { %v2777_v18 = vld [vmem:[#allocation7 + $0x4] ss:$16 sps:$4 sm:$0xff]   ;;  %v2779_v19 = vld [vmem:[#allocation7 + $0xc] ss:$16 sps:$4 sm:$0xff]   ;;  %vm248_vm0 = vcmask 523264   ;;  %v2915_v52 = vshrl.u32 %v143_v51, 7 }
  0x76   :  { %255 = vmatpush1.bf16.msra.mxu0 %v2193_v8  ;;  %298 = vmatpush1.bf16.msra.mxu1 %v2194_v9  ;;  %v2781_v21 = vld [vmem:[#allocation7] ss:$16 sps:$4 sm:$0xff]   ;;  %v2783_v22 = vld [vmem:[#allocation7 + $0x8] ss:$16 sps:$4 sm:$0xff]   ;;  %v2785_v23 = vld [vmem:[#allocation7 + $0x24] ss:$16 sps:$4 sm:$0xff]  }
  0x77   :  { %256 = vmatprep.subr.bf16.mxu0 %v2195_v10  ;;  %299 = vmatprep.subr.bf16.mxu1 %v2197_v11  ;;  %v2789_v24 = vld [vmem:[#allocation7 + $0x2c] ss:$16 sps:$4 sm:$0xff]   ;;  %v2793_v25 = vld [vmem:[#allocation7 + $0x20] ss:$16 sps:$4 sm:$0xff]   ;;  %v2797_v26 = vld [vmem:[#allocation7 + $0x28] ss:$16 sps:$4 sm:$0xff]  }
  0x78   :  { %v2801_v27 = vld [vmem:[#allocation7 + $0x44] ss:$16 sps:$4 sm:$0xff]   ;;  %v2803_v28 = vld [vmem:[#allocation7 + $0x4c] ss:$16 sps:$4 sm:$0xff]   ;;  %v2809_v29 = vld [vmem:[#allocation7 + $0x40] ss:$16 sps:$4 sm:$0xff]  }
  0x79   :  { %v2811_v30 = vld [vmem:[#allocation7 + $0x48] ss:$16 sps:$4 sm:$0xff]   ;;  %v2813_v31 = vld [vmem:[#allocation7 + $0x64] ss:$16 sps:$4 sm:$0xff]   ;;  %v2817_v32 = vld [vmem:[#allocation7 + $0x6c] ss:$16 sps:$4 sm:$0xff]  }
  0x7a   :  { %257 = vmatpush1.bf16.msra.mxu0 %v2199_v12  ;;  %300 = vmatpush1.bf16.msra.mxu1 %v2200_v13  ;;  %v2819_v33 = vld [vmem:[#allocation7 + $0x60] ss:$16 sps:$4 sm:$0xff]   ;;  %v2823_v34 = vld [vmem:[#allocation7 + $0x68] ss:$16 sps:$4 sm:$0xff]   ;;  %v2827_v35 = vld [vmem:[#allocation7 + $0x84] ss:$16 sps:$4 sm:$0xff]  }
  0x7b   :  { %258 = vmatprep.subr.bf16.mxu0 %v2201_v14  ;;  %301 = vmatprep.subr.bf16.mxu1 %v2203_v15  ;;  %v2829_v36 = vld [vmem:[#allocation7 + $0x8c] ss:$16 sps:$4 sm:$0xff]   ;;  %v2833_v37 = vld [vmem:[#allocation7 + $0x80] ss:$16 sps:$4 sm:$0xff]   ;;  %v2835_v38 = vld [vmem:[#allocation7 + $0x88] ss:$16 sps:$4 sm:$0xff]  }
  0x7c   :  { %v2837_v39 = vld [vmem:[#allocation7 + $0xa4] ss:$16 sps:$4 sm:$0xff]   ;;  %v2841_v40 = vld [vmem:[#allocation7 + $0xac] ss:$16 sps:$4 sm:$0xff]   ;;  %v2843_v41 = vld [vmem:[#allocation7 + $0xa0] ss:$16 sps:$4 sm:$0xff]  }
  0x7d   :  { %v2845_v42 = vld [vmem:[#allocation7 + $0xa8] ss:$16 sps:$4 sm:$0xff]   ;;  %v2847_v43 = vld [vmem:[#allocation7 + $0xc4] ss:$16 sps:$4 sm:$0xff]   ;;  %v2849_v44 = vld [vmem:[#allocation7 + $0xcc] ss:$16 sps:$4 sm:$0xff]  }
  0x7e   :  { %259 = vmatpush1.bf16.msra.mxu0 %v2205_v16  ;;  %302 = vmatpush1.bf16.msra.mxu1 %v2206_v17  ;;  %v2855_v45 = vld [vmem:[#allocation7 + $0xc0] ss:$16 sps:$4 sm:$0xff]   ;;  %v2857_v46 = vld [vmem:[#allocation7 + $0xc8] ss:$16 sps:$4 sm:$0xff]   ;;  %v2859_v47 = vld [vmem:[#allocation7 + $0xe4] ss:$16 sps:$4 sm:$0xff]  }
  0x7f   :  { %530 = vmatprep.subr.bf16.mxu0 %v2777_v18  ;;  %571 = vmatprep.subr.bf16.mxu1 %v2779_v19  ;;  %v2861_v48 = vld [vmem:[#allocation7 + $0xec] ss:$16 sps:$4 sm:$0xff]   ;;  %v2867_v49 = vld [vmem:[#allocation7 + $0xe0] ss:$16 sps:$4 sm:$0xff]   ;;  %v2869_v50 = vld [vmem:[#allocation7 + $0xe8] ss:$16 sps:$4 sm:$0xff]  }
  0x80   :  { %v145_v53 = vsub.s32 0, %v2915_v52  ;;  %v153_v54 = vsub.s32 2, %v2915_v52  ;;  %v141_v55 = vld [vmem:[%s3279_s3] sm:$0xf]  ;;  %v3288_v56 = vsub.s32 3, %v2915_v52  ;;  %v149_v57 = vsub.s32 1, %v2915_v52 }
  0x81   :  { %2014 = vmatmul.mubr.msk.bf16.vlgmr.msra.gmra.mrb[0].mxu0 %vm248_vm0, %v2207_v20  ;;  %2015 = vmatmul.mubr.msk.bf16.vlgmr.msra.gmra.mrb[0].mxu1 %vm248_vm0, %v2207_v20  ;;  %vm2621_vm1 = vmmov 0   ;;  %vm1975_vm2 = vcmask 1041408   ;;  %vm1987_vm3 = vcmask 1024  }
  0x82   :  { %531 = vmatpush1.bf16.msra.mxu0 %v2781_v21  ;;  %572 = vmatpush1.bf16.msra.mxu1 %v2783_v22  ;;  %v146_v58 = vrot.slane %v141_v55, %v145_v53  ;;  %v154_v59 = vrot.slane %v141_v55, %v153_v54  ;;  %v158_v62 = vrot.slane %v141_v55, %v3288_v56 }
  0x83   :  { %532 = vmatprep.subr.bf16.mxu0 %v2785_v23  ;;  %573 = vmatprep.subr.bf16.mxu1 %v2789_v24  ;;  %v150_v2 = vrot.slane %v141_v55, %v149_v57 }
  0x84   :  { %562 = vmatprep.mubr.bf16.mxu0 %v2619_v1  ;;  %603 = vmatprep.mubr.bf16.mxu1 %v2619_v1 }
  0x86   :  { %533 = vmatpush1.bf16.msra.mxu0 %v2793_v25  ;;  %574 = vmatpush1.bf16.msra.mxu1 %v2797_v26 }
  0x87   :  { %534 = vmatprep.subr.bf16.mxu0 %v2801_v27  ;;  %575 = vmatprep.subr.bf16.mxu1 %v2803_v28 }
  0x8a   :  { %535 = vmatpush1.bf16.msra.mxu0 %v2809_v29  ;;  %576 = vmatpush1.bf16.msra.mxu1 %v2811_v30 }
  0x8b   :  { %536 = vmatprep.subr.bf16.mxu0 %v2813_v31  ;;  %577 = vmatprep.subr.bf16.mxu1 %v2817_v32 }
  0x8e   :  { %537 = vmatpush1.bf16.msra.mxu0 %v2819_v33  ;;  %578 = vmatpush1.bf16.msra.mxu1 %v2823_v34 }
  0x8f   :  { %538 = vmatprep.subr.bf16.mxu0 %v2827_v35  ;;  %579 = vmatprep.subr.bf16.mxu1 %v2829_v36 }
  0x92   :  { %539 = vmatpush1.bf16.msra.mxu0 %v2833_v37  ;;  %580 = vmatpush1.bf16.msra.mxu1 %v2835_v38 }
  0x93   :  { %540 = vmatprep.subr.bf16.mxu0 %v2837_v39  ;;  %581 = vmatprep.subr.bf16.mxu1 %v2841_v40 }
  0x96   :  { %541 = vmatpush1.bf16.msra.mxu0 %v2843_v41  ;;  %582 = vmatpush1.bf16.msra.mxu1 %v2845_v42 }
  0x97   :  { %542 = vmatprep.subr.bf16.mxu0 %v2847_v43  ;;  %583 = vmatprep.subr.bf16.mxu1 %v2849_v44 }
  0x9a   :  { %543 = vmatpush1.bf16.msra.mxu0 %v2855_v45  ;;  %584 = vmatpush1.bf16.msra.mxu1 %v2857_v46 }
  0x9b   :  { %544 = vmatprep.subr.bf16.mxu0 %v2859_v47  ;;  %585 = vmatprep.subr.bf16.mxu1 %v2861_v48 }
  0x9e   :  { %545 = vmatpush1.bf16.msra.mxu0 %v2867_v49  ;;  %586 = vmatpush1.bf16.msra.mxu1 %v2869_v50 }
  0x9f   :  { %641 = vmatprep.subr.bf16.mxu0 %v2777_v18  ;;  %682 = vmatprep.subr.bf16.mxu1 %v2779_v19 }
  0xa1   :  { %563 = vmatmul.mubr.bf16.vlgmr.msra.gmra.mrb[4].mxu0 %v2619_v1  ;;  %604 = vmatmul.mubr.bf16.vlgmr.msra.gmra.mrb[4].mxu1 %v2619_v1 }
  0xa2   :  { %642 = vmatpush1.bf16.msra.mxu0 %v2781_v21  ;;  %683 = vmatpush1.bf16.msra.mxu1 %v2783_v22 }
  0xa3   :  { %643 = vmatprep.subr.bf16.mxu0 %v2785_v23  ;;  %684 = vmatprep.subr.bf16.mxu1 %v2789_v24 }
  0xa4   :  { %673 = vmatprep.mubr.bf16.mxu0 %v2619_v1  ;;  %714 = vmatprep.mubr.bf16.mxu1 %v2619_v1 }
  0xa6   :  { %644 = vmatpush1.bf16.msra.mxu0 %v2793_v25  ;;  %685 = vmatpush1.bf16.msra.mxu1 %v2797_v26 }
  0xa7   :  { %645 = vmatprep.subr.bf16.mxu0 %v2801_v27  ;;  %686 = vmatprep.subr.bf16.mxu1 %v2803_v28 }
  0xaa   :  { %646 = vmatpush1.bf16.msra.mxu0 %v2809_v29  ;;  %687 = vmatpush1.bf16.msra.mxu1 %v2811_v30 }
  0xab   :  { %647 = vmatprep.subr.bf16.mxu0 %v2813_v31  ;;  %688 = vmatprep.subr.bf16.mxu1 %v2817_v32 }
  0xae   :  { %648 = vmatpush1.bf16.msra.mxu0 %v2819_v33  ;;  %689 = vmatpush1.bf16.msra.mxu1 %v2823_v34 }
  0xaf   :  { %649 = vmatprep.subr.bf16.mxu0 %v2827_v35  ;;  %690 = vmatprep.subr.bf16.mxu1 %v2829_v36 }
  0xb2   :  { %650 = vmatpush1.bf16.msra.mxu0 %v2833_v37  ;;  %691 = vmatpush1.bf16.msra.mxu1 %v2835_v38 }
  0xb3   :  { %651 = vmatprep.subr.bf16.mxu0 %v2837_v39  ;;  %692 = vmatprep.subr.bf16.mxu1 %v2841_v40 }
  0xb6   :  { %652 = vmatpush1.bf16.msra.mxu0 %v2843_v41  ;;  %693 = vmatpush1.bf16.msra.mxu1 %v2845_v42 }
  0xb7   :  { %653 = vmatprep.subr.bf16.mxu0 %v2847_v43  ;;  %694 = vmatprep.subr.bf16.mxu1 %v2849_v44 }
  0xba   :  { %654 = vmatpush1.bf16.msra.mxu0 %v2855_v45  ;;  %695 = vmatpush1.bf16.msra.mxu1 %v2857_v46 }
  0xbb   :  { %655 = vmatprep.subr.bf16.mxu0 %v2859_v47  ;;  %696 = vmatprep.subr.bf16.mxu1 %v2861_v48 }
  0xbe   :  { %656 = vmatpush1.bf16.msra.mxu0 %v2867_v49  ;;  %697 = vmatpush1.bf16.msra.mxu1 %v2869_v50 }
  0xbf   :  { %770 = vmatprep.subr.bf16.mxu0 %v2777_v18  ;;  %811 = vmatprep.subr.bf16.mxu1 %v2779_v19 }
 0x154   :  { %v286_v60 = vpop.f32.mrb[0].mxu0  ;;  %v329_v61 = vpop.f32.mrb[0].mxu1 }
 0x155   :  { %v288_v63 = vpop.f32.mrb[1].mxu0  ;;  %v331_v0 = vpop.f32.mrb[1].mxu1  ;;  %v2938_v11 = vadd.f32 %v286_v60, %v146_v58 }
 0x156   :  { %v290_v3 = vpop.f32.mrb[2].mxu0  ;;  %v333_v4 = vpop.f32.mrb[2].mxu1  ;;  %v2940_v12 = vadd.f32 %v288_v63, %v150_v2  ;;  %v2947_v60 = vadd.f32 %v331_v0, %v158_v62 }
 0x157   :  { %v2930_v5 = vadd.f32 %v290_v3, %v146_v58  ;;  %v292_v6 = vpop.f32.mrb[3].mxu0  ;;  %v2932_v7 = vadd.f32 %v333_v4, %v154_v59  ;;  %v335_v8 = vpop.f32.mrb[3].mxu1 }
 0x158   :  { %v2934_v9 = vadd.f32 %v292_v6, %v150_v2  ;;  %v2936_v10 = vadd.f32 %v335_v8, %v158_v62  ;;  %v2944_v8 = vadd.f32 %v329_v61, %v154_v59 }
 0x174   :  { %v564_v13 = vpop.f32.mrb[4].mxu0  ;;  %v605_v14 = vpop.f32.mrb[4].mxu1 }
 0x175   :  { %v612_v15 = vadd.f32 %v564_v13, %v2938_v11  ;;  %v566_v16 = vpop.f32.mrb[5].mxu0  ;;  %v607_v17 = vpop.f32.mrb[5].mxu1  ;;  %v614_v58 = vadd.f32 %v605_v14, %v2944_v8 }
 0x176   :  { %v613_v20 = vadd.f32 %v566_v16, %v2940_v12  ;;  %v568_v51 = vpop.f32.mrb[6].mxu0  ;;  %v609_v55 = vpop.f32.mrb[6].mxu1  ;;  %v615_v63 = vadd.f32 %v607_v17, %v2947_v60 }
 0x177   :  { %v2048_v57 = vmul.f32 -1.442695, %v612_v15  ;;  %v569_v3 = vpop.f32.mrb[7].mxu0  ;;  %v610_v4 = vpop.f32.mrb[7].mxu1  ;;  %v2050_v2 = vmul.f32 -1.442695, %v614_v58 }
 0x178   :  { %v2049_v6 = vmul.f32 -1.442695, %v613_v20 }
 0x179   :  { %2297 = vpow2.f32 %v2048_v57 }
 0x17a   :  { %2299 = vpow2.f32 %v2049_v6 }
 0x17b   :  { %2301 = vtanh.f32 %v615_v63 }
 0x17c   :  { %2303 = vpow2.f32 %v2050_v2 }
 0x183   :  { %v2298_v13 = vpop.eup %2297 }
 0x184   :  { %v625_v56 = vadd.f32 1.0, %v2298_v13  ;;  %v2300_v16 = vpop.eup %2299 }
 0x185   :  { %v626_v15 = vadd.f32 1.0, %v2300_v16  ;;  %v2302_v20 = vpop.eup %2301 }
 0x186   :  { %2305 = vrcp.f32 %v625_v56  ;;  %v2304_v51 = vpop.eup %2303 }
 0x187   :  { %2307 = vrcp.f32 %v626_v15  ;;  %v627_v57 = vadd.f32 1.0, %v2304_v51 }
 0x189   :  { %2309 = vrcp.f32 %v627_v57 }
 0x190   :  { %v2306_v59 = vpop.eup %2305 }
 0x191   :  { %v636_v61 = vmul.f32 %v2306_v59, %v2302_v20  ;;  %v2308_v55 = vpop.eup %2307 }
 0x192   :  { %v635_v14 = vmul.f32 0.0, %v2308_v55 }
 0x193   :  { %v2310_v0 = vpop.eup %2309 }
 0x194   :  { %v2950_v62 = vadd.f32 %v636_v61, %v635_v14 }
 0x196   :  { %2311 = vtanh.f32 %v2950_v62 }
 0x1a0   :  { %v2312_v17 = vpop.eup %2311 }
 0x1a1   :  { %v639_v3 = vmul.f32 %v2312_v17, %v2310_v0 }
 0x1a3   :  { %v640_v4 = vpack.c.bf16 %v639_v3, %v639_v3 }
 0x1a5   :  { %674 = vmatmul.mubr.bf16.vlgmr.msra.gmra.mrb[8].mxu0 %v640_v4  ;;  %715 = vmatmul.mubr.bf16.vlgmr.msra.gmra.mrb[8].mxu1 %v640_v4 }
 0x1a6   :  { %771 = vmatpush1.bf16.msra.mxu0 %v2781_v21  ;;  %812 = vmatpush1.bf16.msra.mxu1 %v2783_v22 }
 0x1a7   :  { %772 = vmatprep.subr.bf16.mxu0 %v2785_v23  ;;  %813 = vmatprep.subr.bf16.mxu1 %v2789_v24 }
 0x1a8   :  { %802 = vmatprep.mubr.bf16.mxu0 %v2619_v1  ;;  %843 = vmatprep.mubr.bf16.mxu1 %v2619_v1 }
 0x1aa   :  { %773 = vmatpush1.bf16.msra.mxu0 %v2793_v25  ;;  %814 = vmatpush1.bf16.msra.mxu1 %v2797_v26 }
 0x1ab   :  { %774 = vmatprep.subr.bf16.mxu0 %v2801_v27  ;;  %815 = vmatprep.subr.bf16.mxu1 %v2803_v28 }
 0x1ae   :  { %775 = vmatpush1.bf16.msra.mxu0 %v2809_v29  ;;  %816 = vmatpush1.bf16.msra.mxu1 %v2811_v30 }
 0x1af   :  { %776 = vmatprep.subr.bf16.mxu0 %v2813_v31  ;;  %817 = vmatprep.subr.bf16.mxu1 %v2817_v32 }
 0x1b2   :  { %777 = vmatpush1.bf16.msra.mxu0 %v2819_v33  ;;  %818 = vmatpush1.bf16.msra.mxu1 %v2823_v34 }
 0x1b3   :  { %778 = vmatprep.subr.bf16.mxu0 %v2827_v35  ;;  %819 = vmatprep.subr.bf16.mxu1 %v2829_v36 }
 0x1b6   :  { %779 = vmatpush1.bf16.msra.mxu0 %v2833_v37  ;;  %820 = vmatpush1.bf16.msra.mxu1 %v2835_v38 }
 0x1b7   :  { %780 = vmatprep.subr.bf16.mxu0 %v2837_v39  ;;  %821 = vmatprep.subr.bf16.mxu1 %v2841_v40 }
 0x1ba   :  { %781 = vmatpush1.bf16.msra.mxu0 %v2843_v41  ;;  %822 = vmatpush1.bf16.msra.mxu1 %v2845_v42 }
 0x1bb   :  { %782 = vmatprep.subr.bf16.mxu0 %v2847_v43  ;;  %823 = vmatprep.subr.bf16.mxu1 %v2849_v44 }
 0x1be   :  { %783 = vmatpush1.bf16.msra.mxu0 %v2855_v45  ;;  %824 = vmatpush1.bf16.msra.mxu1 %v2857_v46 }
 0x1bf   :  { %784 = vmatprep.subr.bf16.mxu0 %v2859_v47  ;;  %825 = vmatprep.subr.bf16.mxu1 %v2861_v48 }
 0x1c2   :  { %785 = vmatpush1.bf16.msra.mxu0 %v2867_v49  ;;  %826 = vmatpush1.bf16.msra.mxu1 %v2869_v50 }
 0x1c3   :  { %899 = vmatprep.subr.bf16.mxu0 %v2777_v18  ;;  %940 = vmatprep.subr.bf16.mxu1 %v2779_v19 }
 0x278   :  { %v675_v56 = vpop.f32.mrb[8].mxu0  ;;  %v716_v6 = vpop.f32.mrb[8].mxu1 }
 0x279   :  { %v727_v58 = vrot.slane %v675_v56, 6  ;;  %v677_v63 = vpop.f32.mrb[9].mxu0  ;;  %v718_v2 = vpop.f32.mrb[9].mxu1  ;;  %v729_v14 = vrot.slane %v716_v6, 6  ;;  %v759_v6 = vrot.slane %v2950_v62, 6 }
 0x27a   :  { %v728_v13 = vrot.slane %v677_v63, 6  ;;  %v679_v16 = vpop.f32.mrb[10].mxu0  ;;  %v720_v15 = vpop.f32.mrb[10].mxu1  ;;  %v730_v0 = vrot.slane %v718_v2, 6 }
 0x27b   :  { %v735_v20 = vadd.f32 %v727_v58, %v2938_v11  ;;  %v680_v51 = vpop.f32.mrb[11].mxu0  ;;  %v721_v59 = vpop.f32.mrb[11].mxu1  ;;  %v737_v17 = vadd.f32 %v729_v14, %v2944_v8 }
 0x27c   :  { %v736_v61 = vadd.f32 %v728_v13, %v2940_v12  ;;  %v738_v3 = vadd.f32 %v730_v0, %v2947_v60 }
 0x27d   :  { %v2051_v55 = vmul.f32 -1.442695, %v735_v20  ;;  %v2053_v4 = vmul.f32 -1.442695, %v737_v17 }
 0x27e   :  { %v2052_v57 = vmul.f32 -1.442695, %v736_v61 }
 0x27f   :  { %2313 = vpow2.f32 %v2051_v55 }
 0x280   :  { %2315 = vpow2.f32 %v2052_v57 }
 0x281   :  { %2317 = vtanh.f32 %v738_v3 }
 0x282   :  { %2319 = vpow2.f32 %v2053_v4 }
 0x289   :  { %v2314_v56 = vpop.eup %2313 }
 0x28a   :  { %v748_v63 = vadd.f32 1.0, %v2314_v56  ;;  %v2316_v16 = vpop.eup %2315 }
 0x28b   :  { %v749_v58 = vadd.f32 1.0, %v2316_v16  ;;  %v2318_v13 = vpop.eup %2317 }
 0x28c   :  { %2321 = vrcp.f32 %v748_v63  ;;  %v2320_v15 = vpop.eup %2319 }
 0x28d   :  { %2323 = vrcp.f32 %v749_v58  ;;  %v750_v59 = vadd.f32 1.0, %v2320_v15 }
 0x28f   :  { %2325 = vrcp.f32 %v750_v59 }
 0x296   :  { %v2322_v20 = vpop.eup %2321 }
 0x297   :  { %v762_v51 = vmul.f32 %v2322_v20, %v2318_v13  ;;  %v2324_v2 = vpop.eup %2323 }
 0x298   :  { %v761_v61 = vmul.f32 %v2324_v2, %v759_v6 }
 0x299   :  { %v2326_v57 = vpop.eup %2325 }
 0x29a   :  { %v2992_v55 = vadd.f32 %v762_v51, %v761_v61 }
 0x29c   :  { %2327 = vtanh.f32 %v2992_v55 }
 0x2a6   :  { %v2328_v14 = vpop.eup %2327 }
 0x2a7   :  { %v765_v0 = vmul.f32 %v2328_v14, %v2326_v57 }
 0x2a9   :  { %v766_v17 = vpack.c.bf16 %v765_v0, %v765_v0 }
 0x2ab   :  { %v768_v3 = vrot.slane %v766_v17, 1 }
 0x2ad   :  { %803 = vmatmul.mubr.bf16.vlgmr.msra.gmra.mrb[12].mxu0 %v768_v3  ;;  %844 = vmatmul.mubr.bf16.vlgmr.msra.gmra.mrb[12].mxu1 %v768_v3 }
 0x2ae   :  { %900 = vmatpush1.bf16.msra.mxu0 %v2781_v21  ;;  %941 = vmatpush1.bf16.msra.mxu1 %v2783_v22 }
 0x2af   :  { %901 = vmatprep.subr.bf16.mxu0 %v2785_v23  ;;  %942 = vmatprep.subr.bf16.mxu1 %v2789_v24 }
 0x2b0   :  { %931 = vmatprep.mubr.bf16.mxu0 %v2619_v1  ;;  %972 = vmatprep.mubr.bf16.mxu1 %v2619_v1 }
 0x2b2   :  { %902 = vmatpush1.bf16.msra.mxu0 %v2793_v25  ;;  %943 = vmatpush1.bf16.msra.mxu1 %v2797_v26 }
 0x2b3   :  { %903 = vmatprep.subr.bf16.mxu0 %v2801_v27  ;;  %944 = vmatprep.subr.bf16.mxu1 %v2803_v28 }
 0x2b6   :  { %904 = vmatpush1.bf16.msra.mxu0 %v2809_v29  ;;  %945 = vmatpush1.bf16.msra.mxu1 %v2811_v30 }
 0x2b7   :  { %905 = vmatprep.subr.bf16.mxu0 %v2813_v31  ;;  %946 = vmatprep.subr.bf16.mxu1 %v2817_v32 }
 0x2ba   :  { %906 = vmatpush1.bf16.msra.mxu0 %v2819_v33  ;;  %947 = vmatpush1.bf16.msra.mxu1 %v2823_v34 }
 0x2bb   :  { %907 = vmatprep.subr.bf16.mxu0 %v2827_v35  ;;  %948 = vmatprep.subr.bf16.mxu1 %v2829_v36 }
 0x2be   :  { %908 = vmatpush1.bf16.msra.mxu0 %v2833_v37  ;;  %949 = vmatpush1.bf16.msra.mxu1 %v2835_v38 }
 0x2bf   :  { %909 = vmatprep.subr.bf16.mxu0 %v2837_v39  ;;  %950 = vmatprep.subr.bf16.mxu1 %v2841_v40 }
 0x2c2   :  { %910 = vmatpush1.bf16.msra.mxu0 %v2843_v41  ;;  %951 = vmatpush1.bf16.msra.mxu1 %v2845_v42 }
 0x2c3   :  { %911 = vmatprep.subr.bf16.mxu0 %v2847_v43  ;;  %952 = vmatprep.subr.bf16.mxu1 %v2849_v44 }
 0x2c6   :  { %912 = vmatpush1.bf16.msra.mxu0 %v2855_v45  ;;  %953 = vmatpush1.bf16.msra.mxu1 %v2857_v46 }
 0x2c7   :  { %913 = vmatprep.subr.bf16.mxu0 %v2859_v47  ;;  %954 = vmatprep.subr.bf16.mxu1 %v2861_v48 }
 0x2ca   :  { %914 = vmatpush1.bf16.msra.mxu0 %v2867_v49  ;;  %955 = vmatpush1.bf16.msra.mxu1 %v2869_v50 }
 0x2cb   :  { %1028 = vmatprep.subr.bf16.mxu0 %v2777_v18  ;;  %1069 = vmatprep.subr.bf16.mxu1 %v2779_v19 }
 0x380   :  { %v804_v62 = vpop.f32.mrb[12].mxu0  ;;  %v845_v4 = vpop.f32.mrb[12].mxu1 }
 0x381   :  { %v856_v56 = vrot.slane %v804_v62, 4  ;;  %v806_v63 = vpop.f32.mrb[13].mxu0  ;;  %v847_v16 = vpop.f32.mrb[13].mxu1  ;;  %v858_v57 = vrot.slane %v845_v4, 4  ;;  %v888_v4 = vrot.slane %v2992_v55, 6 }
 0x382   :  { %v857_v58 = vrot.slane %v806_v63, 4  ;;  %v808_v13 = vpop.f32.mrb[14].mxu0  ;;  %v849_v15 = vpop.f32.mrb[14].mxu1  ;;  %v859_v14 = vrot.slane %v847_v16, 4 }
 0x383   :  { %v864_v20 = vadd.f32 %v856_v56, %v2938_v11  ;;  %v809_v6 = vpop.f32.mrb[15].mxu0  ;;  %v850_v51 = vpop.f32.mrb[15].mxu1  ;;  %v866_v0 = vadd.f32 %v858_v57, %v2944_v8 }
 0x384   :  { %v865_v2 = vadd.f32 %v857_v58, %v2940_v12  ;;  %v867_v17 = vadd.f32 %v859_v14, %v2947_v60 }
 0x385   :  { %v2054_v59 = vmul.f32 -1.442695, %v864_v20  ;;  %v2056_v3 = vmul.f32 -1.442695, %v866_v0 }
 0x386   :  { %v2055_v61 = vmul.f32 -1.442695, %v865_v2 }
 0x387   :  { %2329 = vpow2.f32 %v2054_v59 }
 0x388   :  { %2331 = vpow2.f32 %v2055_v61 }
 0x389   :  { %2333 = vtanh.f32 %v867_v17 }
 0x38a   :  { %2335 = vpow2.f32 %v2056_v3 }
 0x391   :  { %v2330_v62 = vpop.eup %2329 }
 0x392   :  { %v877_v63 = vadd.f32 1.0, %v2330_v62  ;;  %v2332_v13 = vpop.eup %2331 }
 0x393   :  { %v878_v56 = vadd.f32 1.0, %v2332_v13  ;;  %v2334_v58 = vpop.eup %2333 }
 0x394   :  { %2337 = vrcp.f32 %v877_v63  ;;  %v2336_v15 = vpop.eup %2335 }
 0x395   :  { %2339 = vrcp.f32 %v878_v56  ;;  %v879_v51 = vadd.f32 1.0, %v2336_v15 }
 0x397   :  { %2341 = vrcp.f32 %v879_v51 }
 0x39e   :  { %v2338_v20 = vpop.eup %2337 }
 0x39f   :  { %v891_v6 = vmul.f32 %v2338_v20, %v2334_v58  ;;  %v2340_v16 = vpop.eup %2339 }
 0x3a0   :  { %v890_v2 = vmul.f32 %v2340_v16, %v888_v4 }
 0x3a1   :  { %v2342_v61 = vpop.eup %2341 }
 0x3a2   :  { %v3034_v59 = vadd.f32 %v891_v6, %v890_v2 }
 0x3a4   :  { %2343 = vtanh.f32 %v3034_v59 }
 0x3ae   :  { %v2344_v57 = vpop.eup %2343 }
 0x3af   :  { %v894_v14 = vmul.f32 %v2344_v57, %v2342_v61 }
 0x3b1   :  { %v895_v0 = vpack.c.bf16 %v894_v14, %v894_v14 }
 0x3b3   :  { %v897_v17 = vrot.slane %v895_v0, 2 }
 0x3b5   :  { %932 = vmatmul.mubr.bf16.vlgmr.msra.gmra.mrb[16].mxu0 %v897_v17  ;;  %973 = vmatmul.mubr.bf16.vlgmr.msra.gmra.mrb[16].mxu1 %v897_v17 }
 0x3b6   :  { %1029 = vmatpush1.bf16.msra.mxu0 %v2781_v21  ;;  %1070 = vmatpush1.bf16.msra.mxu1 %v2783_v22 }
 0x3b7   :  { %1030 = vmatprep.subr.bf16.mxu0 %v2785_v23  ;;  %1071 = vmatprep.subr.bf16.mxu1 %v2789_v24 }
 0x3b8   :  { %1060 = vmatprep.mubr.bf16.mxu0 %v2619_v1  ;;  %1101 = vmatprep.mubr.bf16.mxu1 %v2619_v1 }
 0x3ba   :  { %1031 = vmatpush1.bf16.msra.mxu0 %v2793_v25  ;;  %1072 = vmatpush1.bf16.msra.mxu1 %v2797_v26 }
 0x3bb   :  { %1032 = vmatprep.subr.bf16.mxu0 %v2801_v27  ;;  %1073 = vmatprep.subr.bf16.mxu1 %v2803_v28 }
 0x3be   :  { %1033 = vmatpush1.bf16.msra.mxu0 %v2809_v29  ;;  %1074 = vmatpush1.bf16.msra.mxu1 %v2811_v30 }
 0x3bf   :  { %1034 = vmatprep.subr.bf16.mxu0 %v2813_v31  ;;  %1075 = vmatprep.subr.bf16.mxu1 %v2817_v32 }
 0x3c2   :  { %1035 = vmatpush1.bf16.msra.mxu0 %v2819_v33  ;;  %1076 = vmatpush1.bf16.msra.mxu1 %v2823_v34 }
 0x3c3   :  { %1036 = vmatprep.subr.bf16.mxu0 %v2827_v35  ;;  %1077 = vmatprep.subr.bf16.mxu1 %v2829_v36 }
 0x3c6   :  { %1037 = vmatpush1.bf16.msra.mxu0 %v2833_v37  ;;  %1078 = vmatpush1.bf16.msra.mxu1 %v2835_v38 }
 0x3c7   :  { %1038 = vmatprep.subr.bf16.mxu0 %v2837_v39  ;;  %1079 = vmatprep.subr.bf16.mxu1 %v2841_v40 }
 0x3ca   :  { %1039 = vmatpush1.bf16.msra.mxu0 %v2843_v41  ;;  %1080 = vmatpush1.bf16.msra.mxu1 %v2845_v42 }
 0x3cb   :  { %1040 = vmatprep.subr.bf16.mxu0 %v2847_v43  ;;  %1081 = vmatprep.subr.bf16.mxu1 %v2849_v44 }
 0x3ce   :  { %1041 = vmatpush1.bf16.msra.mxu0 %v2855_v45  ;;  %1082 = vmatpush1.bf16.msra.mxu1 %v2857_v46 }
 0x3cf   :  { %1042 = vmatprep.subr.bf16.mxu0 %v2859_v47  ;;  %1083 = vmatprep.subr.bf16.mxu1 %v2861_v48 }
 0x3d2   :  { %1043 = vmatpush1.bf16.msra.mxu0 %v2867_v49  ;;  %1084 = vmatpush1.bf16.msra.mxu1 %v2869_v50 }
 0x3d3   :  { %1142 = vmatprep.subr.bf16.mxu0 %v2777_v18  ;;  %1183 = vmatprep.subr.bf16.mxu1 %v2779_v19 }
 0x488   :  { %v933_v55 = vpop.f32.mrb[16].mxu0  ;;  %v974_v3 = vpop.f32.mrb[16].mxu1 }
 0x489   :  { %v985_v62 = vrot.slane %v933_v55, 2  ;;  %v935_v63 = vpop.f32.mrb[17].mxu0  ;;  %v976_v13 = vpop.f32.mrb[17].mxu1  ;;  %v987_v18 = vrot.slane %v974_v3, 2  ;;  %v1017_v3 = vrot.slane %v3034_v59, 6 }
 0x48a   :  { %v986_v56 = vrot.slane %v935_v63, 2  ;;  %v937_v58 = vpop.f32.mrb[18].mxu0  ;;  %v978_v15 = vpop.f32.mrb[18].mxu1  ;;  %v988_v19 = vrot.slane %v976_v13, 2 }
 0x48b   :  { %v993_v20 = vadd.f32 %v985_v62, %v2938_v11  ;;  %v938_v4 = vpop.f32.mrb[19].mxu0  ;;  %v979_v6 = vpop.f32.mrb[19].mxu1  ;;  %v995_v61 = vadd.f32 %v987_v18, %v2944_v8 }
 0x48c   :  { %v994_v16 = vadd.f32 %v986_v56, %v2940_v12  ;;  %v996_v57 = vadd.f32 %v988_v19, %v2947_v60 }
 0x48d   :  { %v2057_v51 = vmul.f32 -1.442695, %v993_v20  ;;  %v2059_v14 = vmul.f32 -1.442695, %v995_v61 }
 0x48e   :  { %v2058_v2 = vmul.f32 -1.442695, %v994_v16 }
 0x48f   :  { %2345 = vpow2.f32 %v2057_v51 }
 0x490   :  { %2347 = vpow2.f32 %v2058_v2 }
 0x491   :  { %2349 = vtanh.f32 %v996_v57 }
 0x492   :  { %2351 = vpow2.f32 %v2059_v14 }
 0x499   :  { %v2346_v0 = vpop.eup %2345 }
 0x49a   :  { %v1006_v17 = vadd.f32 1.0, %v2346_v0  ;;  %v2348_v55 = vpop.eup %2347 }
 0x49b   :  { %v1007_v11 = vadd.f32 1.0, %v2348_v55  ;;  %v2350_v12 = vpop.eup %2349  ;;  %v3125_v55 = vld [vmem:[#allocation7] ss:$16 sps:$4 sm:$0xff]  }
 0x49c   :  { %2353 = vrcp.f32 %v1006_v17  ;;  %v2352_v62 = vpop.eup %2351 }
 0x49d   :  { %2355 = vrcp.f32 %v1007_v11  ;;  %v1008_v58 = vadd.f32 1.0, %v2352_v62  ;;  %v3128_v11 = vld [vmem:[#allocation7 + $0x8] ss:$16 sps:$4 sm:$0xff]   ;;  %v3134_v62 = vld [vmem:[#allocation7 + $0x2c] ss:$16 sps:$4 sm:$0xff]  }
 0x49f   :  { %2357 = vrcp.f32 %v1008_v58  ;;  %v3151_v58 = vld [vmem:[#allocation7 + $0x40] ss:$16 sps:$4 sm:$0xff]  }
 0x4a6   :  { %v2354_v63 = vpop.eup %2353 }
 0x4a7   :  { %v1020_v56 = vmul.f32 %v2354_v63, %v2350_v12  ;;  %v2356_v13 = vpop.eup %2355  ;;  %v3131_v12 = vld [vmem:[#allocation7 + $0x24] ss:$16 sps:$4 sm:$0xff]   ;;  %v3139_v63 = vld [vmem:[#allocation7 + $0x20] ss:$16 sps:$4 sm:$0xff]  }
 0x4a8   :  { %v1019_v8 = vmul.f32 %v2356_v13, %v1017_v3  ;;  %v3142_v3 = vld [vmem:[#allocation7 + $0x28] ss:$16 sps:$4 sm:$0xff]   ;;  %v3148_v13 = vld [vmem:[#allocation7 + $0x4c] ss:$16 sps:$4 sm:$0xff]  }
 0x4a9   :  { %v2358_v60 = vpop.eup %2357 }
 0x4aa   :  { %v3076_v15 = vadd.f32 %v1020_v56, %v1019_v8  ;;  %v3145_v56 = vld [vmem:[#allocation7 + $0x44] ss:$16 sps:$4 sm:$0xff]   ;;  %v3154_v8 = vld [vmem:[#allocation7 + $0x48] ss:$16 sps:$4 sm:$0xff]  }
 0x4ac   :  { %2359 = vtanh.f32 %v3076_v15  ;;  %v1134_v59 = vrot.slane %v3076_v15, 6  ;;  %v3157_v15 = vld [vmem:[#allocation7 + $0x64] ss:$16 sps:$4 sm:$0xff]  }
 0x4b6   :  { %v2360_v20 = vpop.eup %2359 }
 0x4b7   :  { %v1023_v4 = vmul.f32 %v2360_v20, %v2358_v60  ;;  %v3160_v60 = vld [vmem:[#allocation7 + $0x6c] ss:$16 sps:$4 sm:$0xff]   ;;  %v3163_v20 = vld [vmem:[#allocation7 + $0x60] ss:$16 sps:$4 sm:$0xff]  }
 0x4b9   :  { %v1024_v6 = vpack.c.bf16 %v1023_v4, %v1023_v4  ;;  %v3166_v4 = vld [vmem:[#allocation7 + $0x68] ss:$16 sps:$4 sm:$0xff]  }
 0x4bb   :  { %v1026_v16 = vrot.slane %v1024_v6, 3  ;;  %v3169_v6 = vld [vmem:[#allocation7 + $0x84] ss:$16 sps:$4 sm:$0xff]  }
 0x4bd   :  { %1061 = vmatmul.mubr.bf16.vlgmr.msra.gmra.mrb[20].mxu0 %v1026_v16  ;;  %1102 = vmatmul.mubr.bf16.vlgmr.msra.gmra.mrb[20].mxu1 %v1026_v16  ;;  %v3172_v16 = vld [vmem:[#allocation7 + $0x8c] ss:$16 sps:$4 sm:$0xff]  }
 0x4be   :  { %1143 = vmatpush1.bf16.msra.mxu0 %v2781_v21  ;;  %1184 = vmatpush1.bf16.msra.mxu1 %v2783_v22  ;;  %v3111_v21 = vld [vmem:[#allocation7 + $0x4] ss:$16 sps:$4 sm:$0xff]   ;;  %v3114_v22 = vld [vmem:[#allocation7 + $0xc] ss:$16 sps:$4 sm:$0xff]  }
 0x4bf   :  { %1144 = vmatprep.subr.bf16.mxu0 %v2785_v23  ;;  %1185 = vmatprep.subr.bf16.mxu1 %v2789_v24 }
 0x4c0   :  { %1174 = vmatprep.mubr.bf16.mxu0 %v2619_v1  ;;  %1215 = vmatprep.mubr.bf16.mxu1 %v2619_v1 }
 0x4c2   :  { %1145 = vmatpush1.bf16.msra.mxu0 %v2793_v25  ;;  %1186 = vmatpush1.bf16.msra.mxu1 %v2797_v26 }
 0x4c3   :  { %1146 = vmatprep.subr.bf16.mxu0 %v2801_v27  ;;  %1187 = vmatprep.subr.bf16.mxu1 %v2803_v28 }
 0x4c6   :  { %1147 = vmatpush1.bf16.msra.mxu0 %v2809_v29  ;;  %1188 = vmatpush1.bf16.msra.mxu1 %v2811_v30 }
 0x4c7   :  { %1148 = vmatprep.subr.bf16.mxu0 %v2813_v31  ;;  %1189 = vmatprep.subr.bf16.mxu1 %v2817_v32 }
 0x4ca   :  { %1149 = vmatpush1.bf16.msra.mxu0 %v2819_v33  ;;  %1190 = vmatpush1.bf16.msra.mxu1 %v2823_v34 }
 0x4cb   :  { %1150 = vmatprep.subr.bf16.mxu0 %v2827_v35  ;;  %1191 = vmatprep.subr.bf16.mxu1 %v2829_v36 }
 0x4ce   :  { %1151 = vmatpush1.bf16.msra.mxu0 %v2833_v37  ;;  %1192 = vmatpush1.bf16.msra.mxu1 %v2835_v38 }
 0x4cf   :  { %1152 = vmatprep.subr.bf16.mxu0 %v2837_v39  ;;  %1193 = vmatprep.subr.bf16.mxu1 %v2841_v40 }
 0x4d2   :  { %1153 = vmatpush1.bf16.msra.mxu0 %v2843_v41  ;;  %1194 = vmatpush1.bf16.msra.mxu1 %v2845_v42 }
 0x4d3   :  { %1154 = vmatprep.subr.bf16.mxu0 %v2847_v43  ;;  %1195 = vmatprep.subr.bf16.mxu1 %v2849_v44 }
 0x4d6   :  { %1155 = vmatpush1.bf16.msra.mxu0 %v2855_v45  ;;  %1196 = vmatpush1.bf16.msra.mxu1 %v2857_v46 }
 0x4d7   :  { %1156 = vmatprep.subr.bf16.mxu0 %v2859_v47  ;;  %1197 = vmatprep.subr.bf16.mxu1 %v2861_v48 }
 0x4da   :  { %1157 = vmatpush1.bf16.msra.mxu0 %v2867_v49  ;;  %1198 = vmatpush1.bf16.msra.mxu1 %v2869_v50 }
 0x4db   :  { %1271 = vmatprep.subr.bf16.mxu0 %v3111_v21  ;;  %1312 = vmatprep.subr.bf16.mxu1 %v3114_v22 }
 0x590   :  { %v1062_v23 = vpop.f32.mrb[20].mxu0  ;;  %v1103_v24 = vpop.f32.mrb[20].mxu1 }
 0x591   :  { %v1110_v25 = vadd.f32 %v1062_v23, %v2930_v5  ;;  %v1064_v26 = vpop.f32.mrb[21].mxu0  ;;  %v1105_v27 = vpop.f32.mrb[21].mxu1  ;;  %v1112_v35 = vadd.f32 %v1103_v24, %v2932_v7  ;;  %v3175_v23 = vld [vmem:[#allocation7 + $0x80] ss:$16 sps:$4 sm:$0xff]   ;;  %v3178_v24 = vld [vmem:[#allocation7 + $0x88] ss:$16 sps:$4 sm:$0xff]  }
 0x592   :  { %v1111_v28 = vadd.f32 %v1064_v26, %v2934_v9  ;;  %v1066_v29 = vpop.f32.mrb[22].mxu0  ;;  %v1107_v30 = vpop.f32.mrb[22].mxu1  ;;  %v1113_v36 = vadd.f32 %v1105_v27, %v2936_v10  ;;  %v3184_v26 = vld [vmem:[#allocation7 + $0xac] ss:$16 sps:$4 sm:$0xff]   ;;  %v3187_v27 = vld [vmem:[#allocation7 + $0xa0] ss:$16 sps:$4 sm:$0xff]  }
 0x593   :  { %v2060_v31 = vmul.f32 -1.442695, %v1110_v25  ;;  %v1067_v32 = vpop.f32.mrb[23].mxu0  ;;  %v1108_v33 = vpop.f32.mrb[23].mxu1  ;;  %v2062_v37 = vmul.f32 -1.442695, %v1112_v35 }
 0x594   :  { %v2061_v34 = vmul.f32 -1.442695, %v1111_v28  ;;  %v3181_v25 = vld [vmem:[#allocation7 + $0xa4] ss:$16 sps:$4 sm:$0xff]   ;;  %v3190_v28 = vld [vmem:[#allocation7 + $0xa8] ss:$16 sps:$4 sm:$0xff]  }
 0x595   :  { %2361 = vpow2.f32 %v2060_v31  ;;  %v3193_v29 = vld [vmem:[#allocation7 + $0xc4] ss:$16 sps:$4 sm:$0xff]   ;;  %v3196_v30 = vld [vmem:[#allocation7 + $0xcc] ss:$16 sps:$4 sm:$0xff]  }
 0x596   :  { %2363 = vpow2.f32 %v2061_v34 }
 0x597   :  { %2365 = vtanh.f32 %v1113_v36 }
 0x598   :  { %2367 = vpow2.f32 %v2062_v37 }
 0x59f   :  { %v2362_v38 = vpop.eup %2361 }
 0x5a0   :  { %v1123_v39 = vadd.f32 1.0, %v2362_v38  ;;  %v2364_v40 = vpop.eup %2363 }
 0x5a1   :  { %v1124_v41 = vadd.f32 1.0, %v2364_v40  ;;  %v2366_v42 = vpop.eup %2365 }
 0x5a2   :  { %2369 = vrcp.f32 %v1123_v39  ;;  %v2368_v43 = vpop.eup %2367 }
 0x5a3   :  { %2371 = vrcp.f32 %v1124_v41  ;;  %v1125_v18 = vadd.f32 1.0, %v2368_v43 }
 0x5a5   :  { %2373 = vrcp.f32 %v1125_v18 }
 0x5ac   :  { %v2370_v44 = vpop.eup %2369 }
 0x5ad   :  { %v1137_v51 = vmul.f32 %v2370_v44, %v2366_v42  ;;  %v2372_v2 = vpop.eup %2371 }
 0x5ae   :  { %v1136_v19 = vmul.f32 %v2372_v2, %v1134_v59 }
 0x5af   :  { %v2374_v57 = vpop.eup %2373 }
 0x5b0   :  { %v3122_v61 = vadd.f32 %v1137_v51, %v1136_v19 }
 0x5b2   :  { %2375 = vtanh.f32 %v3122_v61  ;;  %v1260_v19 = vrot.slane %v3122_v61, 6  ;;  %v2463_v61 = vld [vmem:[#allocation7 + $0xc0] ss:$16 sps:$4 sm:$0xff]  }
 0x5bc   :  { %v2376_v14 = vpop.eup %2375 }
 0x5bd   :  { %v1140_v0 = vmul.f32 %v2376_v14, %v2374_v57 }
 0x5bf   :  { %v1141_v17 = vpack.c.bf16 %v1140_v0, %v1140_v0 }
 0x5c1   :  { %1175 = vmatmul.mubr.bf16.vlgmr.msra.gmra.mrb[24].mxu0 %v1141_v17  ;;  %1216 = vmatmul.mubr.bf16.vlgmr.msra.gmra.mrb[24].mxu1 %v1141_v17 }
 0x5c2   :  { %1272 = vmatpush1.bf16.msra.mxu0 %v3125_v55  ;;  %1313 = vmatpush1.bf16.msra.mxu1 %v3128_v11 }
 0x5c3   :  { %1273 = vmatprep.subr.bf16.mxu0 %v3131_v12  ;;  %1314 = vmatprep.subr.bf16.mxu1 %v3134_v62 }
 0x5c4   :  { %1303 = vmatprep.mubr.bf16.mxu0 %v2619_v1  ;;  %1344 = vmatprep.mubr.bf16.mxu1 %v2619_v1 }
 0x5c6   :  { %1274 = vmatpush1.bf16.msra.mxu0 %v3139_v63  ;;  %1315 = vmatpush1.bf16.msra.mxu1 %v3142_v3 }
 0x5c7   :  { %1275 = vmatprep.subr.bf16.mxu0 %v3145_v56  ;;  %1316 = vmatprep.subr.bf16.mxu1 %v3148_v13 }
 0x5ca   :  { %1276 = vmatpush1.bf16.msra.mxu0 %v3151_v58  ;;  %1317 = vmatpush1.bf16.msra.mxu1 %v3154_v8 }
 0x5cb   :  { %1277 = vmatprep.subr.bf16.mxu0 %v3157_v15  ;;  %1318 = vmatprep.subr.bf16.mxu1 %v3160_v60 }
 0x5ce   :  { %1278 = vmatpush1.bf16.msra.mxu0 %v3163_v20  ;;  %1319 = vmatpush1.bf16.msra.mxu1 %v3166_v4 }
 0x5cf   :  { %1279 = vmatprep.subr.bf16.mxu0 %v3169_v6  ;;  %1320 = vmatprep.subr.bf16.mxu1 %v3172_v16 }
 0x5d2   :  { %1280 = vmatpush1.bf16.msra.mxu0 %v3175_v23  ;;  %1321 = vmatpush1.bf16.msra.mxu1 %v3178_v24 }
 0x5d3   :  { %1281 = vmatprep.subr.bf16.mxu0 %v3181_v25  ;;  %1322 = vmatprep.subr.bf16.mxu1 %v3184_v26 }
 0x5d6   :  { %1282 = vmatpush1.bf16.msra.mxu0 %v3187_v27  ;;  %1323 = vmatpush1.bf16.msra.mxu1 %v3190_v28 }
 0x5d7   :  { %1283 = vmatprep.subr.bf16.mxu0 %v3193_v29  ;;  %1324 = vmatprep.subr.bf16.mxu1 %v3196_v30 }
 0x5da   :  { %1284 = vmatpush1.bf16.msra.mxu0 %v2855_v45  ;;  %1325 = vmatpush1.bf16.msra.mxu1 %v2857_v46 }
 0x5db   :  { %1285 = vmatprep.subr.bf16.mxu0 %v2859_v47  ;;  %1326 = vmatprep.subr.bf16.mxu1 %v2861_v48 }
 0x5de   :  { %1286 = vmatpush1.bf16.msra.mxu0 %v2867_v49  ;;  %1327 = vmatpush1.bf16.msra.mxu1 %v2869_v50 }
 0x5df   :  { %1400 = vmatprep.subr.bf16.mxu0 %v3111_v21  ;;  %1441 = vmatprep.subr.bf16.mxu1 %v3114_v22 }
 0x694   :  { %v1176_v31 = vpop.f32.mrb[24].mxu0  ;;  %v1217_v32 = vpop.f32.mrb[24].mxu1 }
 0x695   :  { %v1228_v33 = vrot.slane %v1176_v31, 6  ;;  %v1178_v34 = vpop.f32.mrb[25].mxu0  ;;  %v1219_v35 = vpop.f32.mrb[25].mxu1  ;;  %v1230_v21 = vrot.slane %v1217_v32, 6 }
 0x696   :  { %v1229_v45 = vrot.slane %v1178_v34, 6  ;;  %v1180_v36 = vpop.f32.mrb[26].mxu0  ;;  %v1221_v46 = vpop.f32.mrb[26].mxu1  ;;  %v1231_v22 = vrot.slane %v1219_v35, 6 }
 0x697   :  { %v1236_v47 = vadd.f32 %v1228_v33, %v2930_v5  ;;  %v1181_v37 = vpop.f32.mrb[27].mxu0  ;;  %v1222_v48 = vpop.f32.mrb[27].mxu1  ;;  %v1238_v39 = vadd.f32 %v1230_v21, %v2932_v7 }
 0x698   :  { %v1237_v49 = vadd.f32 %v1229_v45, %v2934_v9  ;;  %v1239_v40 = vadd.f32 %v1231_v22, %v2936_v10 }
 0x699   :  { %v2063_v38 = vmul.f32 -1.442695, %v1236_v47  ;;  %v2065_v41 = vmul.f32 -1.442695, %v1238_v39 }
 0x69a   :  { %v2064_v50 = vmul.f32 -1.442695, %v1237_v49 }
 0x69b   :  { %2377 = vpow2.f32 %v2063_v38 }
 0x69c   :  { %2379 = vpow2.f32 %v2064_v50 }
 0x69d   :  { %2381 = vtanh.f32 %v1239_v40 }
 0x69e   :  { %2383 = vpow2.f32 %v2065_v41 }
 0x6a5   :  { %v2378_v42 = vpop.eup %2377 }
 0x6a6   :  { %v1249_v43 = vadd.f32 1.0, %v2378_v42  ;;  %v2380_v44 = vpop.eup %2379 }
 0x6a7   :  { %v1250_v59 = vadd.f32 1.0, %v2380_v44  ;;  %v2382_v51 = vpop.eup %2381 }
 0x6a8   :  { %2385 = vrcp.f32 %v1249_v43  ;;  %v2384_v2 = vpop.eup %2383 }
 0x6a9   :  { %2387 = vrcp.f32 %v1250_v59  ;;  %v1251_v0 = vadd.f32 1.0, %v2384_v2 }
 0x6ab   :  { %2389 = vrcp.f32 %v1251_v0  ;;  %v2273_v0 = vld [vmem:[#allocation8 + $0x2c] ss:$16 sps:$4 sm:$0xff]  }
 0x6b2   :  { %v2386_v18 = vpop.eup %2385 }
 0x6b3   :  { %v1263_v57 = vmul.f32 %v2386_v18, %v2382_v51  ;;  %v2388_v14 = vpop.eup %2387  ;;  %v2256_v18 = vld [vmem:[#allocation8] ss:$16 sps:$4 sm:$0xff]  }
 0x6b4   :  { %v1262_v17 = vmul.f32 %v2388_v14, %v1260_v19  ;;  %v2265_v19 = vld [vmem:[#allocation8 + $0x8] ss:$16 sps:$4 sm:$0xff]   ;;  %v2261_v14 = vld [vmem:[#allocation8 + $0x24] ss:$16 sps:$4 sm:$0xff]  }
 0x6b5   :  { %v2390_v32 = vpop.eup %2389 }
 0x6b6   :  { %v3212_v31 = vadd.f32 %v1263_v57, %v1262_v17  ;;  %v2259_v17 = vld [vmem:[#allocation8 + $0x20] ss:$16 sps:$4 sm:$0xff]  }
 0x6b8   :  { %2391 = vtanh.f32 %v3212_v31  ;;  %v1389_v22 = vrot.slane %v3212_v31, 6  ;;  %v2271_v31 = vld [vmem:[#allocation8 + $0x28] ss:$16 sps:$4 sm:$0xff]  }
 0x6c2   :  { %v2392_v33 = vpop.eup %2391 }
 0x6c3   :  { %v1266_v34 = vmul.f32 %v2392_v33, %v2390_v32  ;;  %v2264_v32 = vld [vmem:[#allocation8 + $0x44] ss:$16 sps:$4 sm:$0xff]   ;;  %v2277_v33 = vld [vmem:[#allocation8 + $0x4c] ss:$16 sps:$4 sm:$0xff]  }
 0x6c5   :  { %v1267_v35 = vpack.c.bf16 %v1266_v34, %v1266_v34  ;;  %v2262_v34 = vld [vmem:[#allocation8 + $0x40] ss:$16 sps:$4 sm:$0xff]  }
 0x6c7   :  { %v1269_v45 = vrot.slane %v1267_v35, 1  ;;  %v2275_v35 = vld [vmem:[#allocation8 + $0x48] ss:$16 sps:$4 sm:$0xff]  }
 0x6c9   :  { %1304 = vmatmul.mubr.bf16.vlgmr.msra.gmra.mrb[28].mxu0 %v1269_v45  ;;  %1345 = vmatmul.mubr.bf16.vlgmr.msra.gmra.mrb[28].mxu1 %v1269_v45  ;;  %v2270_v45 = vld [vmem:[#allocation8 + $0x64] ss:$16 sps:$4 sm:$0xff]  }
 0x6ca   :  { %1401 = vmatpush1.bf16.msra.mxu0 %v3125_v55  ;;  %1442 = vmatpush1.bf16.msra.mxu1 %v3128_v11  ;;  %v2464_v55 = vld [vmem:[#allocation7 + $0xc8] ss:$16 sps:$4 sm:$0xff]   ;;  %v2465_v11 = vld [vmem:[#allocation7 + $0xe4] ss:$16 sps:$4 sm:$0xff]  }
 0x6cb   :  { %1402 = vmatprep.subr.bf16.mxu0 %v3131_v12  ;;  %1443 = vmatprep.subr.bf16.mxu1 %v3134_v62  ;;  %v2466_v12 = vld [vmem:[#allocation7 + $0xec] ss:$16 sps:$4 sm:$0xff]   ;;  %v2467_v62 = vld [vmem:[#allocation7 + $0xe0] ss:$16 sps:$4 sm:$0xff]  }
 0x6cc   :  { %1432 = vmatprep.mubr.bf16.mxu0 %v2619_v1  ;;  %1473 = vmatprep.mubr.bf16.mxu1 %v2619_v1 }
 0x6ce   :  { %1403 = vmatpush1.bf16.msra.mxu0 %v3139_v63  ;;  %1444 = vmatpush1.bf16.msra.mxu1 %v3142_v3  ;;  %v2468_v63 = vld [vmem:[#allocation7 + $0xe8] ss:$16 sps:$4 sm:$0xff]   ;;  %v2258_v3 = vld [vmem:[#allocation8 + $0x4] ss:$16 sps:$4 sm:$0xff]  }
 0x6cf   :  { %1404 = vmatprep.subr.bf16.mxu0 %v3145_v56  ;;  %1445 = vmatprep.subr.bf16.mxu1 %v3148_v13  ;;  %v2267_v56 = vld [vmem:[#allocation8 + $0xc] ss:$16 sps:$4 sm:$0xff]  }
 0x6d2   :  { %1405 = vmatpush1.bf16.msra.mxu0 %v3151_v58  ;;  %1446 = vmatpush1.bf16.msra.mxu1 %v3154_v8 }
 0x6d3   :  { %1406 = vmatprep.subr.bf16.mxu0 %v3157_v15  ;;  %1447 = vmatprep.subr.bf16.mxu1 %v3160_v60 }
 0x6d6   :  { %1407 = vmatpush1.bf16.msra.mxu0 %v3163_v20  ;;  %1448 = vmatpush1.bf16.msra.mxu1 %v3166_v4 }
 0x6d7   :  { %1408 = vmatprep.subr.bf16.mxu0 %v3169_v6  ;;  %1449 = vmatprep.subr.bf16.mxu1 %v3172_v16 }
 0x6da   :  { %1409 = vmatpush1.bf16.msra.mxu0 %v3175_v23  ;;  %1450 = vmatpush1.bf16.msra.mxu1 %v3178_v24 }
 0x6db   :  { %1410 = vmatprep.subr.bf16.mxu0 %v3181_v25  ;;  %1451 = vmatprep.subr.bf16.mxu1 %v3184_v26 }
 0x6de   :  { %1411 = vmatpush1.bf16.msra.mxu0 %v3187_v27  ;;  %1452 = vmatpush1.bf16.msra.mxu1 %v3190_v28 }
 0x6df   :  { %1412 = vmatprep.subr.bf16.mxu0 %v3193_v29  ;;  %1453 = vmatprep.subr.bf16.mxu1 %v3196_v30 }
 0x6e2   :  { %1413 = vmatpush1.bf16.msra.mxu0 %v2463_v61  ;;  %1454 = vmatpush1.bf16.msra.mxu1 %v2464_v55  ;;  %v2280_v61 = vld [vmem:[#allocation8 + $0x6c] ss:$16 sps:$4 sm:$0xff]  }
 0x6e3   :  { %1414 = vmatprep.subr.bf16.mxu0 %v2465_v11  ;;  %1455 = vmatprep.subr.bf16.mxu1 %v2466_v12  ;;  %v2274_v55 = vld [vmem:[#allocation3 + $0x4] ss:$0 sps:$4 sm:$0x88]   ;;  %v2268_v11 = vld [vmem:[#allocation8 + $0x60] ss:$16 sps:$4 sm:$0xff]  }
 0x6e4   :  { %v2278_v12 = vld [vmem:[#allocation8 + $0x68] ss:$16 sps:$4 sm:$0xff]  }
 0x6e6   :  { %1415 = vmatpush1.bf16.msra.mxu0 %v2467_v62  ;;  %1456 = vmatpush1.bf16.msra.mxu1 %v2468_v63  ;;  %v1562_v62 = vrot.slane %v2274_v55, 3  ;;  %v2620_v63 = vmov 0.0  }
 0x6e7   :  { %1646 = vmatprep.subr.bf16.mxu0 %v2258_v3  ;;  %1686 = vmatprep.subr.bf16.mxu1 %v2267_v56  ;;  %v2282_v3 = vld [vmem:[#allocation10 + $0x8] sm:$0xff]   ;;  %v2283_v56 = vld [vmem:[#allocation11] sm:$0xff]  }
 0x79c   :  { %v1305_v13 = vpop.f32.mrb[28].mxu0  ;;  %v1346_v58 = vpop.f32.mrb[28].mxu1 }
 0x79d   :  { %v1357_v8 = vrot.slane %v1305_v13, 4  ;;  %v1307_v15 = vpop.f32.mrb[29].mxu0  ;;  %v1348_v60 = vpop.f32.mrb[29].mxu1  ;;  %v1359_v28 = vrot.slane %v1346_v58, 4  ;;  %v2284_v13 = vld [vmem:[#allocation10 + $0x10] sm:$0xff]   ;;  %v2285_v58 = vld [vmem:[#allocation11 + $0x8] sm:$0xff]  }
 0x79e   :  { %v1358_v20 = vrot.slane %v1307_v15, 4  ;;  %v1309_v4 = vpop.f32.mrb[30].mxu0  ;;  %v1350_v6 = vpop.f32.mrb[30].mxu1  ;;  %v1360_v29 = vrot.slane %v1348_v60, 4  ;;  %v2287_v15 = vld [vmem:[#allocation11 + $0x10] sm:$0xff]   ;;  %v2288_v60 = vld [vmem:[#allocation10 + $0x20] sm:$0xff]  }
 0x79f   :  { %v1365_v16 = vadd.f32 %v1357_v8, %v2930_v5  ;;  %v1310_v23 = vpop.f32.mrb[31].mxu0  ;;  %v1351_v24 = vpop.f32.mrb[31].mxu1  ;;  %v1367_v30 = vadd.f32 %v1359_v28, %v2932_v7  ;;  %v2286_v8 = vld [vmem:[#allocation10 + $0x18] sm:$0xff]   ;;  %v2290_v4 = vld [vmem:[#allocation10 + $0x28] sm:$0xff]   ;;  %v2291_v6 = vld [vmem:[#allocation11 + $0x20] sm:$0xff]  }
 0x7a0   :  { %v1366_v25 = vadd.f32 %v1358_v20, %v2934_v9  ;;  %v1368_v36 = vadd.f32 %v1360_v29, %v2936_v10  ;;  %v2289_v20 = vld [vmem:[#allocation11 + $0x18] sm:$0xff]   ;;  %v2293_v23 = vld [vmem:[#allocation11 + $0x28] sm:$0xff]  }
 0x7a1   :  { %v2066_v26 = vmul.f32 -1.442695, %v1365_v16  ;;  %v2068_v46 = vmul.f32 -1.442695, %v1367_v30  ;;  %v2292_v16 = vld [vmem:[#allocation10 + $0x30] sm:$0xff]   ;;  %v2294_v24 = vld [vmem:[#allocation10 + $0x38] sm:$0xff]  }
 0x7a2   :  { %v2067_v27 = vmul.f32 -1.442695, %v1366_v25  ;;  %v2295_v25 = vld [vmem:[#allocation11 + $0x30] sm:$0xff]  }
 0x7a3   :  { %2393 = vpow2.f32 %v2066_v26  ;;  %v2296_v26 = vld [vmem:[#allocation11 + $0x38] sm:$0xff]  }
 0x7a4   :  { %2395 = vpow2.f32 %v2067_v27 }
 0x7a5   :  { %2397 = vtanh.f32 %v1368_v36 }
 0x7a6   :  { %2399 = vpow2.f32 %v2068_v46 }
 0x7ad   :  { %v2394_v47 = vpop.eup %2393 }
 0x7ae   :  { %v1378_v37 = vadd.f32 1.0, %v2394_v47  ;;  %v2396_v48 = vpop.eup %2395 }
 0x7af   :  { %v1379_v49 = vadd.f32 1.0, %v2396_v48  ;;  %v2398_v38 = vpop.eup %2397 }
 0x7b0   :  { %2401 = vrcp.f32 %v1378_v37  ;;  %v2400_v50 = vpop.eup %2399 }
 0x7b1   :  { %2403 = vrcp.f32 %v1379_v49  ;;  %v1380_v41 = vadd.f32 1.0, %v2400_v50 }
 0x7b3   :  { %2405 = vrcp.f32 %v1380_v41  ;;  %v1542_v41 = vld [vmem:[%s3281_s5] sm:$0xf] }
 0x7ba   :  { %v2402_v21 = vpop.eup %2401 }
 0x7bb   :  { %v1392_v39 = vmul.f32 %v2402_v21, %v2398_v38  ;;  %v2404_v40 = vpop.eup %2403 }
 0x7bc   :  { %v1391_v42 = vmul.f32 %v2404_v40, %v1389_v22 }
 0x7bd   :  { %v2406_v44 = vpop.eup %2405 }
 0x7be   :  { %v3246_v43 = vadd.f32 %v1392_v39, %v1391_v42 }
 0x7c0   :  { %2407 = vtanh.f32 %v3246_v43 }
 0x7ca   :  { %v2408_v59 = vpop.eup %2407 }
 0x7cb   :  { %v1395_v51 = vmul.f32 %v2408_v59, %v2406_v44 }
 0x7cd   :  { %v1396_v2 = vpack.c.bf16 %v1395_v51, %v1395_v51 }
 0x7cf   :  { %v1398_v57 = vrot.slane %v1396_v2, 2 }
 0x7d1   :  { %1433 = vmatmul.mubr.bf16.vlgmr.msra.gmra.mrb[32].mxu0 %v1398_v57  ;;  %1474 = vmatmul.mubr.bf16.vlgmr.msra.gmra.mrb[32].mxu1 %v1398_v57 }
 0x7d2   :  { %1647 = vmatpush1.bf16.msra.mxu0 %v2256_v18  ;;  %1687 = vmatpush1.bf16.msra.mxu1 %v2265_v19 }
 0x7d3   :  { %1648 = vmatprep.subr.bf16.mxu0 %v2261_v14  ;;  %1688 = vmatprep.subr.bf16.mxu1 %v2273_v0  ;;  %v1551_v0 = vrot.slane %v1542_v41, %v153_v54  ;;  %v1518_v54 = vrot.slane %v3246_v43, 6 }
 0x7d4   :  { %1678 = vmatprep.mubr.bf16.mxu0 %v2619_v1  ;;  %1718 = vmatprep.mubr.bf16.mxu1 %v2619_v1  ;;  %v2281_v1 = vld [vmem:[#allocation10] sm:$0xff]  }
 0x7d6   :  { %1649 = vmatpush1.bf16.msra.mxu0 %v2259_v17  ;;  %1689 = vmatpush1.bf16.msra.mxu1 %v2271_v31 }
 0x7d7   :  { %1650 = vmatprep.subr.bf16.mxu0 %v2264_v32  ;;  %1690 = vmatprep.subr.bf16.mxu1 %v2277_v33 }
 0x7da   :  { %1651 = vmatpush1.bf16.msra.mxu0 %v2262_v34  ;;  %1691 = vmatpush1.bf16.msra.mxu1 %v2275_v35 }
 0x7db   :  { %1652 = vmatprep.subr.bf16.mxu0 %v2270_v45  ;;  %1692 = vmatprep.subr.bf16.mxu1 %v2280_v61  ;;  %v3289_v61 = vsub.s32 3, %v2915_v52 }
 0x7dd   :  { %v1555_v55 = vrot.slane %v1542_v41, %v3289_v61 }
 0x7de   :  { %1653 = vmatpush1.bf16.msra.mxu0 %v2268_v11  ;;  %1693 = vmatpush1.bf16.msra.mxu1 %v2278_v12 }
 0x7df   :  { %2150 = vmatprep.subr.bf16.mxu1 %v2620_v63  ;;  %2130 = vmatprep.subr.bf16.mxu0 %v2620_v63 }
 0x7e1   :  { %2089 = vmatmul.mubr.msk.bf16.vlgmr.msra.gmra.mrb[36].mxu0 %vm248_vm0, %v1562_v62  ;;  %2090 = vmatmul.mubr.msk.bf16.vlgmr.msra.gmra.mrb[36].mxu1 %vm248_vm0, %v1562_v62 }
 0x7e2   :  { %2151 = vmatpush3.bf16.msra.mxu1 %v2281_v1  ;;  %2131 = vmatpush3.bf16.msra.mxu0 %v2283_v56 }
 0x7e3   :  { %2152 = vmatprep.subr.bf16.mxu1 %v2620_v63  ;;  %2132 = vmatprep.subr.bf16.mxu0 %v2620_v63 }
 0x7e4   :  { %2166 = vmatprep.mubr.msk.bf16.mxu1 %vm2621_vm1, %v2620_v63  ;;  %2146 = vmatprep.mubr.msk.bf16.mxu0 %vm2621_vm1, %v2620_v63 }
 0x7e6   :  { %2153 = vmatpush3.bf16.msra.mxu1 %v2282_v3  ;;  %2133 = vmatpush3.bf16.msra.mxu0 %v2285_v58 }
 0x7e7   :  { %2154 = vmatprep.subr.bf16.mxu1 %v2620_v63  ;;  %2134 = vmatprep.subr.bf16.mxu0 %v2620_v63 }
 0x7ea   :  { %2155 = vmatpush3.bf16.msra.mxu1 %v2284_v13  ;;  %2135 = vmatpush3.bf16.msra.mxu0 %v2287_v15 }
 0x7eb   :  { %2156 = vmatprep.subr.bf16.mxu1 %v2620_v63  ;;  %2136 = vmatprep.subr.bf16.mxu0 %v2620_v63 }
 0x7ee   :  { %2157 = vmatpush3.bf16.msra.mxu1 %v2286_v8  ;;  %2137 = vmatpush3.bf16.msra.mxu0 %v2289_v20 }
 0x7ef   :  { %2158 = vmatprep.subr.bf16.mxu1 %v2620_v63  ;;  %2138 = vmatprep.subr.bf16.mxu0 %v2620_v63 }
 0x7f2   :  { %2159 = vmatpush3.bf16.msra.mxu1 %v2288_v60  ;;  %2139 = vmatpush3.bf16.msra.mxu0 %v2291_v6 }
 0x7f3   :  { %2160 = vmatprep.subr.bf16.mxu1 %v2620_v63  ;;  %2140 = vmatprep.subr.bf16.mxu0 %v2620_v63 }
 0x7f6   :  { %2161 = vmatpush3.bf16.msra.mxu1 %v2290_v4  ;;  %2141 = vmatpush3.bf16.msra.mxu0 %v2293_v23 }
 0x7f7   :  { %2162 = vmatprep.subr.bf16.mxu1 %v2620_v63  ;;  %2142 = vmatprep.subr.bf16.mxu0 %v2620_v63 }
 0x7fa   :  { %2163 = vmatpush3.bf16.msra.mxu1 %v2292_v16  ;;  %2143 = vmatpush3.bf16.msra.mxu0 %v2295_v25 }
 0x7fb   :  { %2164 = vmatprep.subr.bf16.mxu1 %v2620_v63  ;;  %2144 = vmatprep.subr.bf16.mxu0 %v2620_v63 }
 0x7fe   :  { %2165 = vmatpush3.bf16.msra.mxu1 %v2294_v24  ;;  %2145 = vmatpush3.bf16.msra.mxu0 %v2296_v26 }
 0x8a4   :  { %v1434_v27 = vpop.f32.mrb[32].mxu0  ;;  %v1475_v28 = vpop.f32.mrb[32].mxu1 }
 0x8a5   :  { %v1486_v29 = vrot.slane %v1434_v27, 2  ;;  %v1436_v30 = vpop.f32.mrb[33].mxu0  ;;  %v1477_v36 = vpop.f32.mrb[33].mxu1  ;;  %v1488_v22 = vrot.slane %v1475_v28, 2 }
 0x8a6   :  { %v1487_v46 = vrot.slane %v1436_v30, 2  ;;  %v1438_v47 = vpop.f32.mrb[34].mxu0  ;;  %v1479_v37 = vpop.f32.mrb[34].mxu1  ;;  %v1489_v42 = vrot.slane %v1477_v36, 2 }
 0x8a7   :  { %v1494_v48 = vadd.f32 %v1486_v29, %v2930_v5  ;;  %v1439_v49 = vpop.f32.mrb[35].mxu0  ;;  %v1480_v38 = vpop.f32.mrb[35].mxu1  ;;  %v1496_v40 = vadd.f32 %v1488_v22, %v2932_v7  ;;  %v1547_v5 = vrot.slane %v1542_v41, %v145_v53 }
 0x8a8   :  { %v1495_v50 = vadd.f32 %v1487_v46, %v2934_v9  ;;  %v1497_v59 = vadd.f32 %v1489_v42, %v2936_v10  ;;  %v2109_v49 = vld [vmem:[%s3284_s8] ss:$0 sm:$0xff] }
 0x8a9   :  { %v2069_v21 = vmul.f32 -1.442695, %v1494_v48  ;;  %v2071_v44 = vmul.f32 -1.442695, %v1496_v40  ;;  %v2110_v40 = vld [vmem:[%s3285_s9] ss:$0 sm:$0xff] }
 0x8aa   :  { %v2070_v39 = vmul.f32 -1.442695, %v1495_v50 }
 0x8ab   :  { %2409 = vpow2.f32 %v2069_v21 }
 0x8ac   :  { %2411 = vpow2.f32 %v2070_v39 }
 0x8ad   :  { %2413 = vpow2.f32 %v2071_v44 }
 0x8ae   :  { %2415 = vtanh.f32 %v1497_v59 }
 0x8b4   :  { %v1680_v51 = vpop.f32.mrb[36].mxu0  ;;  %v1720_v9 = vpop.f32.mrb[36].mxu1 }
 0x8b5   :  { %v2410_v2 = vpop.eup %2409  ;;  %v1681_v18 = vadd.f32 %v1680_v51, %v1547_v5  ;;  %v1682_v19 = vpop.f32.mrb[37].mxu0  ;;  %v1721_v34 = vadd.f32 %v1720_v9, %v1551_v0  ;;  %v2111_v5 = vld [vmem:[#allocation2] ss:$0 sm:$0xff] }
 0x8b6   :  { %v1722_v57 = vpop.f32.mrb[37].mxu1  ;;  %v1507_v7 = vadd.f32 1.0, %v2410_v2  ;;  %v1683_v14 = vpop.f32.mrb[38].mxu0 }
 0x8b7   :  { %v1724_v17 = vpop.f32.mrb[38].mxu1  ;;  %v2412_v31 = vpop.eup %2411  ;;  %v2091_v32 = vmul.f32 -1.442695, %v1681_v18  ;;  %v2092_v35 = vmul.f32 -1.442695, %v1721_v34  ;;  %v1723_v63 = vadd.f32 %v1722_v57, %v1555_v55 }
 0x8b8   :  { %v1684_v33 = vpop.f32.mrb[39].mxu0  ;;  %2417 = vrcp.f32 %v1507_v7  ;;  %v1508_v53 = vadd.f32 1.0, %v2412_v31  ;;  %v1725_v10 = vpop.f32.mrb[39].mxu1 }
 0x8b9   :  { %v2414_v45 = vpop.eup %2413 }
 0x8ba   :  { %2419 = vrcp.f32 %v1508_v53  ;;  %v2416_v11 = vpop.eup %2415  ;;  %v1509_v62 = vadd.f32 1.0, %v2414_v45 }
 0x8bb   :  { %2421 = vpow2.f32 %v2091_v32 }
 0x8bc   :  { %2423 = vpow2.f32 %v2092_v35 }
 0x8bd   :  { %2425 = vrcp.f32 %v1509_v62 }
 0x8be   :  { %2427 = vtanh.f32 %v1723_v63 }
 0x8c2   :  { %v2418_v12 = vpop.eup %2417 }
 0x8c3   :  { %v1521_v1 = vmul.f32 %v2418_v12, %v2416_v11 }
 0x8c4   :  { %v2420_v3 = vpop.eup %2419 }
 0x8c5   :  { %v2422_v56 = vpop.eup %2421  ;;  %v1520_v13 = vmul.f32 %v2420_v3, %v1518_v54 }
 0x8c6   :  { %v1730_v58 = vadd.f32 1.0, %v2422_v56  ;;  %v2424_v15 = vpop.eup %2423 }
 0x8c7   :  { %v1522_v8 = vadd.f32 %v1521_v1, %v1520_v13  ;;  %v1736_v52 = vadd.f32 1.0, %v2424_v15  ;;  %v2426_v60 = vpop.eup %2425 }
 0x8c8   :  { %2429 = vrcp.f32 %v1730_v58  ;;  %v2428_v20 = vpop.eup %2427 }
 0x8c9   :  { %2431 = vtanh.f32 %v1522_v8 }
 0x8ca   :  { %2433 = vrcp.f32 %v1736_v52 }
 0x8d2   :  { %v2430_v4 = vpop.eup %2429 }
 0x8d3   :  { %v2432_v6 = vpop.eup %2431  ;;  %v1740_v16 = vmul.f32 %v2430_v4, %v2428_v20 }
 0x8d4   :  { %v1524_v43 = vmul.f32 %v2432_v6, %v2426_v60  ;;  %v2434_v26 = vpop.eup %2433 }
 0x8d5   :  { %2435 = vtanh.f32 %v1740_v16 }
 0x8d6   :  { %v1743_v23 = vmax.f32 %v1524_v43, 0.0 }
 0x8d8   :  { %v1745_v24 = vpack.c.bf16 %v1743_v23, %v1743_v23 }
 0x8da   :  { %v1868_v25 = vrot.slane %v1745_v24, 3 }
 0x8dc   :  { %2167 = vmatmul.mubr.bf16.vlgmr.msra.gmra.mrb[40].mxu1 %v1868_v25 }
 0x8df   :  { %v2436_v27 = vpop.eup %2435 }
 0x8e0   :  { %v1742_v28 = vmul.f32 %v2436_v27, %v2434_v26 }
 0x8e2   :  { %v1744_v29 = vmax.f32 %v1742_v28, 0.0 }
 0x8e4   :  { %v1762_v30 = vpack.c.bf16 %v1744_v29, %v1744_v29 }
 0x8e6   :  { %2147 = vmatmul.mubr.bf16.vlgmr.msra.gmra.mrb[40].mxu0 %v1762_v30 }
 0x9af   :  { %v1952_v36 = vpop.f32.mrb[40].mxu1 }
 0x9b0   :  { %v2168_v46 = vpop.f32.mrb[41].mxu1 }
 0x9b1   :  { %v1955_v47 = vpop.f32.mrb[42].mxu1 }
 0x9b2   :  { %v2169_v37 = vpop.f32.mrb[43].mxu1 }
 0x9b9   :  { %v1861_v48 = vpop.f32.mrb[40].mxu0 }
 0x9ba   :  { %v1953_v38 = vadd.f32 %v1952_v36, %v1861_v48  ;;  %v2148_v50 = vpop.f32.mrb[41].mxu0 }
 0x9bb   :  { %v1864_v21 = vpop.f32.mrb[42].mxu0 }
 0x9bc   :  { %v1965_v22 = vadd.f32 %v2109_v49, %v1953_v38  ;;  %v2149_v39 = vpop.f32.mrb[43].mxu0 }
 0x9be   :  { %v1966_v41 = vmax.f32 %v1965_v22, 0.0 }
 0x9c0   :  { %v1974_v42 = vmul.f32 %v2110_v40, %v1966_v41 }
 0x9c2   :  { %v1976_v44 = vsel %vm1975_vm2, %v1974_v42, 0.0 }
 0x9c3   :  { %1977 = vadd.xlane.f32.xlu0 %v1976_v44 }
 0xa50   :  { %v1978_v59 = vpop.xlane.xlu0 %1977 }
 0xa51   :  { %v1986_v51 = vadd.f32 %v2111_v5, %v1978_v59 }
 0xa53   :  { %1988 = vst.msk [vmem:[%s3287_s11] sm:$0x3] %vm1987_vm3, %v1986_v51 }
 0xa54   :  { %1993 = vsyncpa [#allocation4], 1 }
 0xa55   :  { %1994 = vsyncpa [#allocation6], 1 }
 0xa56   :  { %1995 = vsyncpa [#allocation9], 1 }
 0xa57   :  { %1996 = vsyncpa [#allocation12], 1 }

</bundles_post_ra>
